<compile_context>
chip_gen: v6e
topology: v6e:2x2x1
jax: 0.10.0
libtpu: 0.0.40
codegen_flags: <defaults>
</compile_context>

<pallas_src>
import math

import jax
import jax.numpy as jnp
from jax import lax
from jax.experimental import pallas as pl
from jax.experimental.pallas import tpu as pltpu

# ---------------- model hyper-parameters (small, consistent with the module) ----
B = 2          # batch
L = 8          # sequence length
D = 32         # d_model (== `features`)
H = 4          # heads
DK = D // H    # d_k
DFF = 64       # d_ff
EPS = 1e-6
NEG = -1000000000.0


def _layernorm_fused(x, gamma, beta, n):
    """PyTorch LayerNormalization semantics (unbiased std, divide by std+eps),
    computed in one pass: sum and sum-of-squares reductions are independent,
    and the per-row divide becomes one reciprocal + multiplies."""
    s1 = jnp.sum(x, axis=-1, keepdims=True)
    s2 = jnp.sum(x * x, axis=-1, keepdims=True)
    mean = s1 * (1.0 / n)
    var = jnp.maximum(s2 - s1 * mean, 0.0) * (1.0 / (n - 1))
    inv = pl.reciprocal(jnp.sqrt(var) + EPS, approx=False)
    return (x - mean) * inv * gamma + beta


def encoder_block_kernel(x_ref, m_ref,
                         wqkv_ref, bqkv_ref, wo_ref, bo_ref,
                         w1_ref, b1_ref, w2_ref, b2_ref, ln_ref,
                         o_ref):
    x = x_ref[...]                                 # (B*L, D) — tokens folded on rows
    wo = wo_ref[...]                               # (D, D)
    ln = ln_ref[...]                               # (4, D): g1, b1, g2, b2
    gamma1, beta1 = ln[0:1, :], ln[1:2, :]
    gamma2, beta2 = ln[2:3, :], ln[3:4, :]

    # ---- residual 0 : pre-norm + self-attention ------------------------------
    xn = _layernorm_fused(x, gamma1, beta1, D)

    # Fused QKV projection: one (B*L, D) @ (D, 3D) MXU push.
    qkv = jnp.dot(xn, wqkv_ref[...], preferred_element_type=jnp.float32) + bqkv_ref[...]
    scale = 1.0 / math.sqrt(DK)
    q = qkv[:, 0:D] * scale                        # fold 1/sqrt(d_k) once
    k = qkv[:, D:2 * D]
    v = qkv[:, 2 * D:3 * D]

    attn_rows = []
    for b in range(B):                             # static loop over batch (B=2)
        rows = slice(b * L, (b + 1) * L)
        qb, kb, vb = q[rows], k[rows], v[rows]     # (L, D) static row slices
        # Hoisted mask: compare + broadcast emitted once per batch, not per head.
        keep = jnp.broadcast_to(m_ref[b:b + 1, :], (L, L)) != 0.0     # (L, L) bool
        acc = jnp.zeros((L, D), jnp.float32)
        for h in range(H):                         # static loop over heads (H=4)
            cols = slice(h * DK, (h + 1) * DK)
            # q_h @ k_h^T without materializing the transpose.
            s = lax.dot_general(qb[:, cols], kb[:, cols],
                                (((1,), (1,)), ((), ())),
                                preferred_element_type=jnp.float32)   # (L, L)
            s = jnp.where(keep, s, NEG)            # masked_fill(mask==0, -1e9)
            s = s - jnp.max(s, axis=-1, keepdims=True)
            p = jnp.exp(s)
            p = p * pl.reciprocal(jnp.sum(p, axis=-1, keepdims=True), approx=False)
            ctx = jnp.dot(p, vb[:, cols], preferred_element_type=jnp.float32)  # (L, DK)
            # Fold this head's slice of the output projection; avoids the lane-axis
            # concatenate of head outputs entirely.
            acc = acc + jnp.dot(ctx, wo[cols, :], preferred_element_type=jnp.float32)
        attn_rows.append(acc)
    attn = jnp.concatenate(attn_rows, axis=0)      # (B*L, D) row-axis stack
    x1 = x + attn + bo_ref[...]                    # residual add (+ out_proj bias)

    # ---- residual 1 : pre-norm + feed-forward --------------------------------
    xn2 = _layernorm_fused(x1, gamma2, beta2, D)
    h1 = jnp.maximum(
        jnp.dot(xn2, w1_ref[...], preferred_element_type=jnp.float32) + b1_ref[...], 0.0)
    ff = jnp.dot(h1, w2_ref[...], preferred_element_type=jnp.float32) + b2_ref[...]

    o_ref[...] = x1 + ff


def encoder_block(x, mask, params):
    (wq, bq, wk, bk, wv, bv, wo, bo, g1, be1, g2, be2, w1, b1, w2, b2) = params

    # Pack parameters once in the wrapper (fewer, wider refs / DMAs).
    wqkv = jnp.concatenate([wq, wk, wv], axis=1)        # (D, 3D)
    bqkv = jnp.concatenate([bq, bk, bv], axis=1)        # (1, 3D)
    ln = jnp.concatenate([g1, be1, g2, be2], axis=0)    # (4, D)
    x2d = x.reshape(B * L, D)                           # fold batch into rows (free)
    mask2d = mask.reshape(B, L).astype(jnp.float32)     # key-padding mask, compact

    vmem = pl.BlockSpec(memory_space=pltpu.MemorySpace.VMEM)
    out2d = pl.pallas_call(
        encoder_block_kernel,
        out_shape=jax.ShapeDtypeStruct((B * L, D), jnp.float32),
        in_specs=[vmem] * 11,
        out_specs=vmem,
    )(x2d, mask2d, wqkv, bqkv, wo, bo, w1, b1, w2, b2, ln)
    return out2d.reshape(B, L, D)


def encoder_block_ref(x, mask, params):
    """Pure-JAX reference reproducing the PyTorch forward (dropout = identity)."""
    (wq, bq, wk, bk, wv, bv, wo, bo, g1, be1, g2, be2, w1, b1, w2, b2) = params

    def ln(x, g, b):
        mean = jnp.mean(x, axis=-1, keepdims=True)
        var = jnp.sum((x - mean) ** 2, axis=-1, keepdims=True) / (x.shape[-1] - 1)
        return g * (x - mean) / (jnp.sqrt(var) + EPS) + b

    # residual 0: self-attention on LN(x)
    xn = ln(x, g1, be1)
    q = (xn @ wq + bq).reshape(B, L, H, DK).transpose(0, 2, 1, 3)   # [B,H,L,DK]
    k = (xn @ wk + bk).reshape(B, L, H, DK).transpose(0, 2, 1, 3)
    v = (xn @ wv + bv).reshape(B, L, H, DK).transpose(0, 2, 1, 3)
    scores = jnp.einsum('bhld,bhmd->bhlm', q, k) / math.sqrt(DK)
    scores = jnp.where(mask == 0.0, NEG, scores)                    # mask [B,1,1,L]
    attn = jax.nn.softmax(scores, axis=-1)
    ctx = jnp.einsum('bhlm,bhmd->bhld', attn, v)
    ctx = ctx.transpose(0, 2, 1, 3).reshape(B, L, D)
    x1 = x + (ctx @ wo + bo)

    # residual 1: feed-forward on LN(x1)
    xn2 = ln(x1, g2, be2)
    ff = jnp.maximum(xn2 @ w1 + b1, 0.0) @ w2 + b2
    return x1 + ff


if __name__ == "__main__":
    key = jax.random.PRNGKey(0)
    ks = jax.random.split(key, 16)

    def rnd(k, shape, scale=0.1):
        return (scale * jax.random.normal(k, shape)).astype(jnp.float32)

    # Parameters (nn.Linear weights stored pre-transposed as (in, out)).
    params = (
        rnd(ks[0], (D, D)),  rnd(ks[1], (1, D)),    # Wq, bq
        rnd(ks[2], (D, D)),  rnd(ks[3], (1, D)),    # Wk, bk
        rnd(ks[4], (D, D)),  rnd(ks[5], (1, D)),    # Wv, bv
        rnd(ks[6], (D, D)),  rnd(ks[7], (1, D)),    # Wo, bo
        jnp.ones((1, D), jnp.float32), jnp.zeros((1, D), jnp.float32),   # gamma1, beta1
        jnp.ones((1, D), jnp.float32), jnp.zeros((1, D), jnp.float32),   # gamma2, beta2
        rnd(ks[8], (D, DFF)), rnd(ks[9], (1, DFF)),   # W1, b1
        rnd(ks[10], (DFF, D)), rnd(ks[11], (1, D)),   # W2, b2
    )

    x = jax.random.normal(ks[12], (B, L, D), dtype=jnp.float32)
    # src_mask: [B, 1, 1, L] key-padding mask. Batch 0 fully visible,
    # batch 1 has the last 2 key positions masked out.
    mask = jnp.ones((B, 1, 1, L), jnp.float32)
    mask = mask.at[1, 0, 0, L - 2:].set(0.0)

    out = encoder_block(x, mask, params)
    out = jax.block_until_ready(out)

    ref = encoder_block_ref(x, mask, params)
    assert out.shape == (B, L, D)
    assert jnp.allclose(out, ref, atol=1e-4, rtol=1e-4), \
        f"max err {jnp.max(jnp.abs(out - ref))}"

    print("KERNEL_OK")
</pallas_src>

<mosaic_0001>
module attributes {stable_mosaic.version = 11 : i64} {
  func.func @encoder_block_kernel(%arg0: memref<16x32xf32, #tpu.memory_space<vmem>>, %arg1: memref<2x8xf32, #tpu.memory_space<vmem>>, %arg2: memref<32x96xf32, #tpu.memory_space<vmem>>, %arg3: memref<1x96xf32, #tpu.memory_space<vmem>>, %arg4: memref<32x32xf32, #tpu.memory_space<vmem>>, %arg5: memref<1x32xf32, #tpu.memory_space<vmem>>, %arg6: memref<32x64xf32, #tpu.memory_space<vmem>>, %arg7: memref<1x64xf32, #tpu.memory_space<vmem>>, %arg8: memref<64x32xf32, #tpu.memory_space<vmem>>, %arg9: memref<1x32xf32, #tpu.memory_space<vmem>>, %arg10: memref<4x32xf32, #tpu.memory_space<vmem>>, %arg11: memref<16x32xf32, #tpu.memory_space<vmem>>) attributes {dimension_semantics = [], scalar_prefetch = 0 : i64, scratch_operands = 0 : i64, tpu.core_type = #tpu.core_type<tc>} {
    %c0 = arith.constant 0 : index
    %c0_0 = arith.constant 0 : index
    %0 = vector.load %arg0[%c0, %c0_0] : memref<16x32xf32, #tpu.memory_space<vmem>>, vector<16x32xf32>
    %c0_1 = arith.constant 0 : index
    %c0_2 = arith.constant 0 : index
    %1 = vector.load %arg4[%c0_1, %c0_2] : memref<32x32xf32, #tpu.memory_space<vmem>>, vector<32x32xf32>
    %c0_3 = arith.constant 0 : index
    %c0_4 = arith.constant 0 : index
    %2 = vector.load %arg10[%c0_3, %c0_4] : memref<4x32xf32, #tpu.memory_space<vmem>>, vector<4x32xf32>
    %3 = vector.extract_strided_slice %2 {offsets = [0, 0], sizes = [1, 32], strides = [1, 1]} : vector<4x32xf32> to vector<1x32xf32>
    %4 = vector.extract_strided_slice %2 {offsets = [1, 0], sizes = [1, 32], strides = [1, 1]} : vector<4x32xf32> to vector<1x32xf32>
    %5 = vector.extract_strided_slice %2 {offsets = [2, 0], sizes = [1, 32], strides = [1, 1]} : vector<4x32xf32> to vector<1x32xf32>
    %6 = vector.extract_strided_slice %2 {offsets = [3, 0], sizes = [1, 32], strides = [1, 1]} : vector<4x32xf32> to vector<1x32xf32>
    %cst = arith.constant dense<0.000000e+00> : vector<16xf32>
    %7 = vector.multi_reduction <add>, %0, %cst [1] : vector<16x32xf32> to vector<16xf32>
    %8 = vector.shape_cast %7 : vector<16xf32> to vector<16x1xf32>
    %9 = arith.mulf %0, %0 : vector<16x32xf32>
    %cst_5 = arith.constant dense<0.000000e+00> : vector<16xf32>
    %10 = vector.multi_reduction <add>, %9, %cst_5 [1] : vector<16x32xf32> to vector<16xf32>
    %11 = vector.shape_cast %10 : vector<16xf32> to vector<16x1xf32>
    %cst_6 = arith.constant 3.125000e-02 : f32
    %12 = vector.broadcast %cst_6 : f32 to vector<16x1xf32>
    %13 = arith.mulf %8, %12 : vector<16x1xf32>
    %14 = arith.mulf %8, %13 : vector<16x1xf32>
    %15 = arith.subf %11, %14 : vector<16x1xf32>
    %cst_7 = arith.constant 0.000000e+00 : f32
    %16 = vector.broadcast %cst_7 : f32 to vector<16x1xf32>
    %17 = arith.maximumf %15, %16 : vector<16x1xf32>
    %cst_8 = arith.constant 0.0322580636 : f32
    %18 = vector.broadcast %cst_8 : f32 to vector<16x1xf32>
    %19 = arith.mulf %17, %18 : vector<16x1xf32>
    %20 = math.sqrt %19 : vector<16x1xf32>
    %cst_9 = arith.constant 9.99999997E-7 : f32
    %21 = vector.broadcast %cst_9 : f32 to vector<16x1xf32>
    %22 = arith.addf %20, %21 : vector<16x1xf32>
    %23 = tpu.reciprocal %22 : vector<16x1xf32> -> vector<16x1xf32>
    %24 = vector.broadcast %13 : vector<16x1xf32> to vector<16x32xf32>
    %25 = arith.subf %0, %24 : vector<16x32xf32>
    %26 = vector.broadcast %23 : vector<16x1xf32> to vector<16x32xf32>
    %27 = arith.mulf %25, %26 : vector<16x32xf32>
    %28 = vector.broadcast %3 : vector<1x32xf32> to vector<16x32xf32>
    %29 = arith.mulf %27, %28 : vector<16x32xf32>
    %30 = vector.broadcast %4 : vector<1x32xf32> to vector<16x32xf32>
    %31 = arith.addf %29, %30 : vector<16x32xf32>
    %c0_10 = arith.constant 0 : index
    %c0_11 = arith.constant 0 : index
    %32 = vector.load %arg2[%c0_10, %c0_11] : memref<32x96xf32, #tpu.memory_space<vmem>>, vector<32x96xf32>
    %cst_12 = arith.constant dense<0.000000e+00> : vector<16x96xf32>
    %33 = tpu.matmul %31, %32, %cst_12 {dimension_numbers = #tpu.dot_dimension_numbers<[1], [0], [0], [1], [0, 0, 1, 1], [], []>} : vector<16x32xf32>, vector<32x96xf32>, vector<16x96xf32> -> vector<16x96xf32>
    %c0_13 = arith.constant 0 : index
    %c0_14 = arith.constant 0 : index
    %34 = vector.load %arg3[%c0_13, %c0_14] : memref<1x96xf32, #tpu.memory_space<vmem>>, vector<1x96xf32>
    %35 = vector.broadcast %34 : vector<1x96xf32> to vector<16x96xf32>
    %36 = arith.addf %33, %35 : vector<16x96xf32>
    %37 = vector.extract_strided_slice %36 {offsets = [0, 0], sizes = [16, 32], strides = [1, 1]} : vector<16x96xf32> to vector<16x32xf32>
    %cst_15 = arith.constant 0.353553385 : f32
    %38 = vector.broadcast %cst_15 : f32 to vector<16x32xf32>
    %39 = arith.mulf %37, %38 : vector<16x32xf32>
    %40 = vector.extract_strided_slice %36 {offsets = [0, 32], sizes = [16, 32], strides = [1, 1]} : vector<16x96xf32> to vector<16x32xf32>
    %41 = vector.extract_strided_slice %36 {offsets = [0, 64], sizes = [16, 32], strides = [1, 1]} : vector<16x96xf32> to vector<16x32xf32>
    %42 = vector.extract_strided_slice %39 {offsets = [0, 0], sizes = [8, 32], strides = [1, 1]} : vector<16x32xf32> to vector<8x32xf32>
    %43 = vector.extract_strided_slice %40 {offsets = [0, 0], sizes = [8, 32], strides = [1, 1]} : vector<16x32xf32> to vector<8x32xf32>
    %44 = vector.extract_strided_slice %41 {offsets = [0, 0], sizes = [8, 32], strides = [1, 1]} : vector<16x32xf32> to vector<8x32xf32>
    %c0_16 = arith.constant 0 : index
    %c0_17 = arith.constant 0 : index
    %45 = vector.load %arg1[%c0_16, %c0_17] : memref<2x8xf32, #tpu.memory_space<vmem>>, vector<1x8xf32>
    %46 = vector.shape_cast %45 : vector<1x8xf32> to vector<1x8xf32>
    %47 = vector.broadcast %46 : vector<1x8xf32> to vector<8x8xf32>
    %cst_18 = arith.constant 0.000000e+00 : f32
    %48 = vector.broadcast %cst_18 : f32 to vector<8x8xf32>
    %49 = arith.cmpf one, %47, %48 : vector<8x8xf32>
    %cst_19 = arith.constant 0.000000e+00 : f32
    %50 = vector.broadcast %cst_19 : f32 to vector<8x32xf32>
    %51 = vector.extract_strided_slice %42 {offsets = [0, 0], sizes = [8, 8], strides = [1, 1]} : vector<8x32xf32> to vector<8x8xf32>
    %52 = vector.extract_strided_slice %43 {offsets = [0, 0], sizes = [8, 8], strides = [1, 1]} : vector<8x32xf32> to vector<8x8xf32>
    %cst_20 = arith.constant dense<0.000000e+00> : vector<8x8xf32>
    %53 = tpu.matmul %51, %52, %cst_20 {dimension_numbers = #tpu.dot_dimension_numbers<[1], [1], [0], [0], [0, 0, 1, 0], [], []>} : vector<8x8xf32>, vector<8x8xf32>, vector<8x8xf32> -> vector<8x8xf32>
    %cst_21 = arith.constant -1.000000e+09 : f32
    %54 = vector.broadcast %cst_21 : f32 to vector<8x8xf32>
    %55 = arith.select %49, %53, %54 : vector<8x8xi1>, vector<8x8xf32>
    %cst_22 = arith.constant dense<0xFF800000> : vector<8xf32>
    %56 = vector.multi_reduction <maximumf>, %55, %cst_22 [1] : vector<8x8xf32> to vector<8xf32>
    %57 = vector.shape_cast %56 : vector<8xf32> to vector<8x1xf32>
    %58 = vector.broadcast %57 : vector<8x1xf32> to vector<8x8xf32>
    %59 = arith.subf %55, %58 : vector<8x8xf32>
    %60 = math.exp %59 : vector<8x8xf32>
    %cst_23 = arith.constant dense<0.000000e+00> : vector<8xf32>
    %61 = vector.multi_reduction <add>, %60, %cst_23 [1] : vector<8x8xf32> to vector<8xf32>
    %62 = vector.shape_cast %61 : vector<8xf32> to vector<8x1xf32>
    %63 = tpu.reciprocal %62 : vector<8x1xf32> -> vector<8x1xf32>
    %64 = vector.broadcast %63 : vector<8x1xf32> to vector<8x8xf32>
    %65 = arith.mulf %60, %64 : vector<8x8xf32>
    %66 = vector.extract_strided_slice %44 {offsets = [0, 0], sizes = [8, 8], strides = [1, 1]} : vector<8x32xf32> to vector<8x8xf32>
    %cst_24 = arith.constant dense<0.000000e+00> : vector<8x8xf32>
    %67 = tpu.matmul %65, %66, %cst_24 {dimension_numbers = #tpu.dot_dimension_numbers<[1], [0], [0], [1], [0, 0, 1, 1], [], []>} : vector<8x8xf32>, vector<8x8xf32>, vector<8x8xf32> -> vector<8x8xf32>
    %68 = vector.extract_strided_slice %1 {offsets = [0, 0], sizes = [8, 32], strides = [1, 1]} : vector<32x32xf32> to vector<8x32xf32>
    %cst_25 = arith.constant dense<0.000000e+00> : vector<8x32xf32>
    %69 = tpu.matmul %67, %68, %cst_25 {dimension_numbers = #tpu.dot_dimension_numbers<[1], [0], [0], [1], [0, 0, 1, 1], [], []>} : vector<8x8xf32>, vector<8x32xf32>, vector<8x32xf32> -> vector<8x32xf32>
    %70 = arith.addf %50, %69 : vector<8x32xf32>
    %71 = vector.extract_strided_slice %42 {offsets = [0, 8], sizes = [8, 8], strides = [1, 1]} : vector<8x32xf32> to vector<8x8xf32>
    %72 = vector.extract_strided_slice %43 {offsets = [0, 8], sizes = [8, 8], strides = [1, 1]} : vector<8x32xf32> to vector<8x8xf32>
    %cst_26 = arith.constant dense<0.000000e+00> : vector<8x8xf32>
    %73 = tpu.matmul %71, %72, %cst_26 {dimension_numbers = #tpu.dot_dimension_numbers<[1], [1], [0], [0], [0, 0, 1, 0], [], []>} : vector<8x8xf32>, vector<8x8xf32>, vector<8x8xf32> -> vector<8x8xf32>
    %cst_27 = arith.constant -1.000000e+09 : f32
    %74 = vector.broadcast %cst_27 : f32 to vector<8x8xf32>
    %75 = arith.select %49, %73, %74 : vector<8x8xi1>, vector<8x8xf32>
    %cst_28 = arith.constant dense<0xFF800000> : vector<8xf32>
    %76 = vector.multi_reduction <maximumf>, %75, %cst_28 [1] : vector<8x8xf32> to vector<8xf32>
    %77 = vector.shape_cast %76 : vector<8xf32> to vector<8x1xf32>
    %78 = vector.broadcast %77 : vector<8x1xf32> to vector<8x8xf32>
    %79 = arith.subf %75, %78 : vector<8x8xf32>
    %80 = math.exp %79 : vector<8x8xf32>
    %cst_29 = arith.constant dense<0.000000e+00> : vector<8xf32>
    %81 = vector.multi_reduction <add>, %80, %cst_29 [1] : vector<8x8xf32> to vector<8xf32>
    %82 = vector.shape_cast %81 : vector<8xf32> to vector<8x1xf32>
    %83 = tpu.reciprocal %82 : vector<8x1xf32> -> vector<8x1xf32>
    %84 = vector.broadcast %83 : vector<8x1xf32> to vector<8x8xf32>
    %85 = arith.mulf %80, %84 : vector<8x8xf32>
    %86 = vector.extract_strided_slice %44 {offsets = [0, 8], sizes = [8, 8], strides = [1, 1]} : vector<8x32xf32> to vector<8x8xf32>
    %cst_30 = arith.constant dense<0.000000e+00> : vector<8x8xf32>
    %87 = tpu.matmul %85, %86, %cst_30 {dimension_numbers = #tpu.dot_dimension_numbers<[1], [0], [0], [1], [0, 0, 1, 1], [], []>} : vector<8x8xf32>, vector<8x8xf32>, vector<8x8xf32> -> vector<8x8xf32>
    %88 = vector.extract_strided_slice %1 {offsets = [8, 0], sizes = [8, 32], strides = [1, 1]} : vector<32x32xf32> to vector<8x32xf32>
    %cst_31 = arith.constant dense<0.000000e+00> : vector<8x32xf32>
    %89 = tpu.matmul %87, %88, %cst_31 {dimension_numbers = #tpu.dot_dimension_numbers<[1], [0], [0], [1], [0, 0, 1, 1], [], []>} : vector<8x8xf32>, vector<8x32xf32>, vector<8x32xf32> -> vector<8x32xf32>
    %90 = arith.addf %70, %89 : vector<8x32xf32>
    %91 = vector.extract_strided_slice %42 {offsets = [0, 16], sizes = [8, 8], strides = [1, 1]} : vector<8x32xf32> to vector<8x8xf32>
    %92 = vector.extract_strided_slice %43 {offsets = [0, 16], sizes = [8, 8], strides = [1, 1]} : vector<8x32xf32> to vector<8x8xf32>
    %cst_32 = arith.constant dense<0.000000e+00> : vector<8x8xf32>
    %93 = tpu.matmul %91, %92, %cst_32 {dimension_numbers = #tpu.dot_dimension_numbers<[1], [1], [0], [0], [0, 0, 1, 0], [], []>} : vector<8x8xf32>, vector<8x8xf32>, vector<8x8xf32> -> vector<8x8xf32>
    %cst_33 = arith.constant -1.000000e+09 : f32
    %94 = vector.broadcast %cst_33 : f32 to vector<8x8xf32>
    %95 = arith.select %49, %93, %94 : vector<8x8xi1>, vector<8x8xf32>
    %cst_34 = arith.constant dense<0xFF800000> : vector<8xf32>
    %96 = vector.multi_reduction <maximumf>, %95, %cst_34 [1] : vector<8x8xf32> to vector<8xf32>
    %97 = vector.shape_cast %96 : vector<8xf32> to vector<8x1xf32>
    %98 = vector.broadcast %97 : vector<8x1xf32> to vector<8x8xf32>
    %99 = arith.subf %95, %98 : vector<8x8xf32>
    %100 = math.exp %99 : vector<8x8xf32>
    %cst_35 = arith.constant dense<0.000000e+00> : vector<8xf32>
    %101 = vector.multi_reduction <add>, %100, %cst_35 [1] : vector<8x8xf32> to vector<8xf32>
    %102 = vector.shape_cast %101 : vector<8xf32> to vector<8x1xf32>
    %103 = tpu.reciprocal %102 : vector<8x1xf32> -> vector<8x1xf32>
    %104 = vector.broadcast %103 : vector<8x1xf32> to vector<8x8xf32>
    %105 = arith.mulf %100, %104 : vector<8x8xf32>
    %106 = vector.extract_strided_slice %44 {offsets = [0, 16], sizes = [8, 8], strides = [1, 1]} : vector<8x32xf32> to vector<8x8xf32>
    %cst_36 = arith.constant dense<0.000000e+00> : vector<8x8xf32>
    %107 = tpu.matmul %105, %106, %cst_36 {dimension_numbers = #tpu.dot_dimension_numbers<[1], [0], [0], [1], [0, 0, 1, 1], [], []>} : vector<8x8xf32>, vector<8x8xf32>, vector<8x8xf32> -> vector<8x8xf32>
    %108 = vector.extract_strided_slice %1 {offsets = [16, 0], sizes = [8, 32], strides = [1, 1]} : vector<32x32xf32> to vector<8x32xf32>
    %cst_37 = arith.constant dense<0.000000e+00> : vector<8x32xf32>
    %109 = tpu.matmul %107, %108, %cst_37 {dimension_numbers = #tpu.dot_dimension_numbers<[1], [0], [0], [1], [0, 0, 1, 1], [], []>} : vector<8x8xf32>, vector<8x32xf32>, vector<8x32xf32> -> vector<8x32xf32>
    %110 = arith.addf %90, %109 : vector<8x32xf32>
    %111 = vector.extract_strided_slice %42 {offsets = [0, 24], sizes = [8, 8], strides = [1, 1]} : vector<8x32xf32> to vector<8x8xf32>
    %112 = vector.extract_strided_slice %43 {offsets = [0, 24], sizes = [8, 8], strides = [1, 1]} : vector<8x32xf32> to vector<8x8xf32>
    %cst_38 = arith.constant dense<0.000000e+00> : vector<8x8xf32>
    %113 = tpu.matmul %111, %112, %cst_38 {dimension_numbers = #tpu.dot_dimension_numbers<[1], [1], [0], [0], [0, 0, 1, 0], [], []>} : vector<8x8xf32>, vector<8x8xf32>, vector<8x8xf32> -> vector<8x8xf32>
    %cst_39 = arith.constant -1.000000e+09 : f32
    %114 = vector.broadcast %cst_39 : f32 to vector<8x8xf32>
    %115 = arith.select %49, %113, %114 : vector<8x8xi1>, vector<8x8xf32>
    %cst_40 = arith.constant dense<0xFF800000> : vector<8xf32>
    %116 = vector.multi_reduction <maximumf>, %115, %cst_40 [1] : vector<8x8xf32> to vector<8xf32>
    %117 = vector.shape_cast %116 : vector<8xf32> to vector<8x1xf32>
    %118 = vector.broadcast %117 : vector<8x1xf32> to vector<8x8xf32>
    %119 = arith.subf %115, %118 : vector<8x8xf32>
    %120 = math.exp %119 : vector<8x8xf32>
    %cst_41 = arith.constant dense<0.000000e+00> : vector<8xf32>
    %121 = vector.multi_reduction <add>, %120, %cst_41 [1] : vector<8x8xf32> to vector<8xf32>
    %122 = vector.shape_cast %121 : vector<8xf32> to vector<8x1xf32>
    %123 = tpu.reciprocal %122 : vector<8x1xf32> -> vector<8x1xf32>
    %124 = vector.broadcast %123 : vector<8x1xf32> to vector<8x8xf32>
    %125 = arith.mulf %120, %124 : vector<8x8xf32>
    %126 = vector.extract_strided_slice %44 {offsets = [0, 24], sizes = [8, 8], strides = [1, 1]} : vector<8x32xf32> to vector<8x8xf32>
    %cst_42 = arith.constant dense<0.000000e+00> : vector<8x8xf32>
    %127 = tpu.matmul %125, %126, %cst_42 {dimension_numbers = #tpu.dot_dimension_numbers<[1], [0], [0], [1], [0, 0, 1, 1], [], []>} : vector<8x8xf32>, vector<8x8xf32>, vector<8x8xf32> -> vector<8x8xf32>
    %128 = vector.extract_strided_slice %1 {offsets = [24, 0], sizes = [8, 32], strides = [1, 1]} : vector<32x32xf32> to vector<8x32xf32>
    %cst_43 = arith.constant dense<0.000000e+00> : vector<8x32xf32>
    %129 = tpu.matmul %127, %128, %cst_43 {dimension_numbers = #tpu.dot_dimension_numbers<[1], [0], [0], [1], [0, 0, 1, 1], [], []>} : vector<8x8xf32>, vector<8x32xf32>, vector<8x32xf32> -> vector<8x32xf32>
    %130 = arith.addf %110, %129 : vector<8x32xf32>
    %131 = vector.extract_strided_slice %39 {offsets = [8, 0], sizes = [8, 32], strides = [1, 1]} : vector<16x32xf32> to vector<8x32xf32>
    %132 = vector.extract_strided_slice %40 {offsets = [8, 0], sizes = [8, 32], strides = [1, 1]} : vector<16x32xf32> to vector<8x32xf32>
    %133 = vector.extract_strided_slice %41 {offsets = [8, 0], sizes = [8, 32], strides = [1, 1]} : vector<16x32xf32> to vector<8x32xf32>
    %c1 = arith.constant 1 : index
    %c0_44 = arith.constant 0 : index
    %134 = vector.load %arg1[%c1, %c0_44] : memref<2x8xf32, #tpu.memory_space<vmem>>, vector<1x8xf32>
    %135 = vector.shape_cast %134 : vector<1x8xf32> to vector<1x8xf32>
    %136 = vector.broadcast %135 : vector<1x8xf32> to vector<8x8xf32>
    %cst_45 = arith.constant 0.000000e+00 : f32
    %137 = vector.broadcast %cst_45 : f32 to vector<8x8xf32>
    %138 = arith.cmpf one, %136, %137 : vector<8x8xf32>
    %cst_46 = arith.constant 0.000000e+00 : f32
    %139 = vector.broadcast %cst_46 : f32 to vector<8x32xf32>
    %140 = vector.extract_strided_slice %131 {offsets = [0, 0], sizes = [8, 8], strides = [1, 1]} : vector<8x32xf32> to vector<8x8xf32>
    %141 = vector.extract_strided_slice %132 {offsets = [0, 0], sizes = [8, 8], strides = [1, 1]} : vector<8x32xf32> to vector<8x8xf32>
    %cst_47 = arith.constant dense<0.000000e+00> : vector<8x8xf32>
    %142 = tpu.matmul %140, %141, %cst_47 {dimension_numbers = #tpu.dot_dimension_numbers<[1], [1], [0], [0], [0, 0, 1, 0], [], []>} : vector<8x8xf32>, vector<8x8xf32>, vector<8x8xf32> -> vector<8x8xf32>
    %cst_48 = arith.constant -1.000000e+09 : f32
    %143 = vector.broadcast %cst_48 : f32 to vector<8x8xf32>
    %144 = arith.select %138, %142, %143 : vector<8x8xi1>, vector<8x8xf32>
    %cst_49 = arith.constant dense<0xFF800000> : vector<8xf32>
    %145 = vector.multi_reduction <maximumf>, %144, %cst_49 [1] : vector<8x8xf32> to vector<8xf32>
    %146 = vector.shape_cast %145 : vector<8xf32> to vector<8x1xf32>
    %147 = vector.broadcast %146 : vector<8x1xf32> to vector<8x8xf32>
    %148 = arith.subf %144, %147 : vector<8x8xf32>
    %149 = math.exp %148 : vector<8x8xf32>
    %cst_50 = arith.constant dense<0.000000e+00> : vector<8xf32>
    %150 = vector.multi_reduction <add>, %149, %cst_50 [1] : vector<8x8xf32> to vector<8xf32>
    %151 = vector.shape_cast %150 : vector<8xf32> to vector<8x1xf32>
    %152 = tpu.reciprocal %151 : vector<8x1xf32> -> vector<8x1xf32>
    %153 = vector.broadcast %152 : vector<8x1xf32> to vector<8x8xf32>
    %154 = arith.mulf %149, %153 : vector<8x8xf32>
    %155 = vector.extract_strided_slice %133 {offsets = [0, 0], sizes = [8, 8], strides = [1, 1]} : vector<8x32xf32> to vector<8x8xf32>
    %cst_51 = arith.constant dense<0.000000e+00> : vector<8x8xf32>
    %156 = tpu.matmul %154, %155, %cst_51 {dimension_numbers = #tpu.dot_dimension_numbers<[1], [0], [0], [1], [0, 0, 1, 1], [], []>} : vector<8x8xf32>, vector<8x8xf32>, vector<8x8xf32> -> vector<8x8xf32>
    %157 = vector.extract_strided_slice %1 {offsets = [0, 0], sizes = [8, 32], strides = [1, 1]} : vector<32x32xf32> to vector<8x32xf32>
    %cst_52 = arith.constant dense<0.000000e+00> : vector<8x32xf32>
    %158 = tpu.matmul %156, %157, %cst_52 {dimension_numbers = #tpu.dot_dimension_numbers<[1], [0], [0], [1], [0, 0, 1, 1], [], []>} : vector<8x8xf32>, vector<8x32xf32>, vector<8x32xf32> -> vector<8x32xf32>
    %159 = arith.addf %139, %158 : vector<8x32xf32>
    %160 = vector.extract_strided_slice %131 {offsets = [0, 8], sizes = [8, 8], strides = [1, 1]} : vector<8x32xf32> to vector<8x8xf32>
    %161 = vector.extract_strided_slice %132 {offsets = [0, 8], sizes = [8, 8], strides = [1, 1]} : vector<8x32xf32> to vector<8x8xf32>
    %cst_53 = arith.constant dense<0.000000e+00> : vector<8x8xf32>
    %162 = tpu.matmul %160, %161, %cst_53 {dimension_numbers = #tpu.dot_dimension_numbers<[1], [1], [0], [0], [0, 0, 1, 0], [], []>} : vector<8x8xf32>, vector<8x8xf32>, vector<8x8xf32> -> vector<8x8xf32>
    %cst_54 = arith.constant -1.000000e+09 : f32
    %163 = vector.broadcast %cst_54 : f32 to vector<8x8xf32>
    %164 = arith.select %138, %162, %163 : vector<8x8xi1>, vector<8x8xf32>
    %cst_55 = arith.constant dense<0xFF800000> : vector<8xf32>
    %165 = vector.multi_reduction <maximumf>, %164, %cst_55 [1] : vector<8x8xf32> to vector<8xf32>
    %166 = vector.shape_cast %165 : vector<8xf32> to vector<8x1xf32>
    %167 = vector.broadcast %166 : vector<8x1xf32> to vector<8x8xf32>
    %168 = arith.subf %164, %167 : vector<8x8xf32>
    %169 = math.exp %168 : vector<8x8xf32>
    %cst_56 = arith.constant dense<0.000000e+00> : vector<8xf32>
    %170 = vector.multi_reduction <add>, %169, %cst_56 [1] : vector<8x8xf32> to vector<8xf32>
    %171 = vector.shape_cast %170 : vector<8xf32> to vector<8x1xf32>
    %172 = tpu.reciprocal %171 : vector<8x1xf32> -> vector<8x1xf32>
    %173 = vector.broadcast %172 : vector<8x1xf32> to vector<8x8xf32>
    %174 = arith.mulf %169, %173 : vector<8x8xf32>
    %175 = vector.extract_strided_slice %133 {offsets = [0, 8], sizes = [8, 8], strides = [1, 1]} : vector<8x32xf32> to vector<8x8xf32>
    %cst_57 = arith.constant dense<0.000000e+00> : vector<8x8xf32>
    %176 = tpu.matmul %174, %175, %cst_57 {dimension_numbers = #tpu.dot_dimension_numbers<[1], [0], [0], [1], [0, 0, 1, 1], [], []>} : vector<8x8xf32>, vector<8x8xf32>, vector<8x8xf32> -> vector<8x8xf32>
    %177 = vector.extract_strided_slice %1 {offsets = [8, 0], sizes = [8, 32], strides = [1, 1]} : vector<32x32xf32> to vector<8x32xf32>
    %cst_58 = arith.constant dense<0.000000e+00> : vector<8x32xf32>
    %178 = tpu.matmul %176, %177, %cst_58 {dimension_numbers = #tpu.dot_dimension_numbers<[1], [0], [0], [1], [0, 0, 1, 1], [], []>} : vector<8x8xf32>, vector<8x32xf32>, vector<8x32xf32> -> vector<8x32xf32>
    %179 = arith.addf %159, %178 : vector<8x32xf32>
    %180 = vector.extract_strided_slice %131 {offsets = [0, 16], sizes = [8, 8], strides = [1, 1]} : vector<8x32xf32> to vector<8x8xf32>
    %181 = vector.extract_strided_slice %132 {offsets = [0, 16], sizes = [8, 8], strides = [1, 1]} : vector<8x32xf32> to vector<8x8xf32>
    %cst_59 = arith.constant dense<0.000000e+00> : vector<8x8xf32>
    %182 = tpu.matmul %180, %181, %cst_59 {dimension_numbers = #tpu.dot_dimension_numbers<[1], [1], [0], [0], [0, 0, 1, 0], [], []>} : vector<8x8xf32>, vector<8x8xf32>, vector<8x8xf32> -> vector<8x8xf32>
    %cst_60 = arith.constant -1.000000e+09 : f32
    %183 = vector.broadcast %cst_60 : f32 to vector<8x8xf32>
    %184 = arith.select %138, %182, %183 : vector<8x8xi1>, vector<8x8xf32>
    %cst_61 = arith.constant dense<0xFF800000> : vector<8xf32>
    %185 = vector.multi_reduction <maximumf>, %184, %cst_61 [1] : vector<8x8xf32> to vector<8xf32>
    %186 = vector.shape_cast %185 : vector<8xf32> to vector<8x1xf32>
    %187 = vector.broadcast %186 : vector<8x1xf32> to vector<8x8xf32>
    %188 = arith.subf %184, %187 : vector<8x8xf32>
    %189 = math.exp %188 : vector<8x8xf32>
    %cst_62 = arith.constant dense<0.000000e+00> : vector<8xf32>
    %190 = vector.multi_reduction <add>, %189, %cst_62 [1] : vector<8x8xf32> to vector<8xf32>
    %191 = vector.shape_cast %190 : vector<8xf32> to vector<8x1xf32>
    %192 = tpu.reciprocal %191 : vector<8x1xf32> -> vector<8x1xf32>
    %193 = vector.broadcast %192 : vector<8x1xf32> to vector<8x8xf32>
    %194 = arith.mulf %189, %193 : vector<8x8xf32>
    %195 = vector.extract_strided_slice %133 {offsets = [0, 16], sizes = [8, 8], strides = [1, 1]} : vector<8x32xf32> to vector<8x8xf32>
    %cst_63 = arith.constant dense<0.000000e+00> : vector<8x8xf32>
    %196 = tpu.matmul %194, %195, %cst_63 {dimension_numbers = #tpu.dot_dimension_numbers<[1], [0], [0], [1], [0, 0, 1, 1], [], []>} : vector<8x8xf32>, vector<8x8xf32>, vector<8x8xf32> -> vector<8x8xf32>
    %197 = vector.extract_strided_slice %1 {offsets = [16, 0], sizes = [8, 32], strides = [1, 1]} : vector<32x32xf32> to vector<8x32xf32>
    %cst_64 = arith.constant dense<0.000000e+00> : vector<8x32xf32>
    %198 = tpu.matmul %196, %197, %cst_64 {dimension_numbers = #tpu.dot_dimension_numbers<[1], [0], [0], [1], [0, 0, 1, 1], [], []>} : vector<8x8xf32>, vector<8x32xf32>, vector<8x32xf32> -> vector<8x32xf32>
    %199 = arith.addf %179, %198 : vector<8x32xf32>
    %200 = vector.extract_strided_slice %131 {offsets = [0, 24], sizes = [8, 8], strides = [1, 1]} : vector<8x32xf32> to vector<8x8xf32>
    %201 = vector.extract_strided_slice %132 {offsets = [0, 24], sizes = [8, 8], strides = [1, 1]} : vector<8x32xf32> to vector<8x8xf32>
    %cst_65 = arith.constant dense<0.000000e+00> : vector<8x8xf32>
    %202 = tpu.matmul %200, %201, %cst_65 {dimension_numbers = #tpu.dot_dimension_numbers<[1], [1], [0], [0], [0, 0, 1, 0], [], []>} : vector<8x8xf32>, vector<8x8xf32>, vector<8x8xf32> -> vector<8x8xf32>
    %cst_66 = arith.constant -1.000000e+09 : f32
    %203 = vector.broadcast %cst_66 : f32 to vector<8x8xf32>
    %204 = arith.select %138, %202, %203 : vector<8x8xi1>, vector<8x8xf32>
    %cst_67 = arith.constant dense<0xFF800000> : vector<8xf32>
    %205 = vector.multi_reduction <maximumf>, %204, %cst_67 [1] : vector<8x8xf32> to vector<8xf32>
    %206 = vector.shape_cast %205 : vector<8xf32> to vector<8x1xf32>
    %207 = vector.broadcast %206 : vector<8x1xf32> to vector<8x8xf32>
    %208 = arith.subf %204, %207 : vector<8x8xf32>
    %209 = math.exp %208 : vector<8x8xf32>
    %cst_68 = arith.constant dense<0.000000e+00> : vector<8xf32>
    %210 = vector.multi_reduction <add>, %209, %cst_68 [1] : vector<8x8xf32> to vector<8xf32>
    %211 = vector.shape_cast %210 : vector<8xf32> to vector<8x1xf32>
    %212 = tpu.reciprocal %211 : vector<8x1xf32> -> vector<8x1xf32>
    %213 = vector.broadcast %212 : vector<8x1xf32> to vector<8x8xf32>
    %214 = arith.mulf %209, %213 : vector<8x8xf32>
    %215 = vector.extract_strided_slice %133 {offsets = [0, 24], sizes = [8, 8], strides = [1, 1]} : vector<8x32xf32> to vector<8x8xf32>
    %cst_69 = arith.constant dense<0.000000e+00> : vector<8x8xf32>
    %216 = tpu.matmul %214, %215, %cst_69 {dimension_numbers = #tpu.dot_dimension_numbers<[1], [0], [0], [1], [0, 0, 1, 1], [], []>} : vector<8x8xf32>, vector<8x8xf32>, vector<8x8xf32> -> vector<8x8xf32>
    %217 = vector.extract_strided_slice %1 {offsets = [24, 0], sizes = [8, 32], strides = [1, 1]} : vector<32x32xf32> to vector<8x32xf32>
    %cst_70 = arith.constant dense<0.000000e+00> : vector<8x32xf32>
    %218 = tpu.matmul %216, %217, %cst_70 {dimension_numbers = #tpu.dot_dimension_numbers<[1], [0], [0], [1], [0, 0, 1, 1], [], []>} : vector<8x8xf32>, vector<8x32xf32>, vector<8x32xf32> -> vector<8x32xf32>
    %219 = arith.addf %199, %218 : vector<8x32xf32>
    %220 = tpu.concatenate %130, %219 in 0 : vector<8x32xf32>, vector<8x32xf32> -> vector<16x32xf32>
    %221 = arith.addf %0, %220 : vector<16x32xf32>
    %c0_71 = arith.constant 0 : index
    %c0_72 = arith.constant 0 : index
    %222 = vector.load %arg5[%c0_71, %c0_72] : memref<1x32xf32, #tpu.memory_space<vmem>>, vector<1x32xf32>
    %223 = vector.broadcast %222 : vector<1x32xf32> to vector<16x32xf32>
    %224 = arith.addf %221, %223 : vector<16x32xf32>
    %cst_73 = arith.constant dense<0.000000e+00> : vector<16xf32>
    %225 = vector.multi_reduction <add>, %224, %cst_73 [1] : vector<16x32xf32> to vector<16xf32>
    %226 = vector.shape_cast %225 : vector<16xf32> to vector<16x1xf32>
    %227 = arith.mulf %224, %224 : vector<16x32xf32>
    %cst_74 = arith.constant dense<0.000000e+00> : vector<16xf32>
    %228 = vector.multi_reduction <add>, %227, %cst_74 [1] : vector<16x32xf32> to vector<16xf32>
    %229 = vector.shape_cast %228 : vector<16xf32> to vector<16x1xf32>
    %cst_75 = arith.constant 3.125000e-02 : f32
    %230 = vector.broadcast %cst_75 : f32 to vector<16x1xf32>
    %231 = arith.mulf %226, %230 : vector<16x1xf32>
    %232 = arith.mulf %226, %231 : vector<16x1xf32>
    %233 = arith.subf %229, %232 : vector<16x1xf32>
    %cst_76 = arith.constant 0.000000e+00 : f32
    %234 = vector.broadcast %cst_76 : f32 to vector<16x1xf32>
    %235 = arith.maximumf %233, %234 : vector<16x1xf32>
    %cst_77 = arith.constant 0.0322580636 : f32
    %236 = vector.broadcast %cst_77 : f32 to vector<16x1xf32>
    %237 = arith.mulf %235, %236 : vector<16x1xf32>
    %238 = math.sqrt %237 : vector<16x1xf32>
    %cst_78 = arith.constant 9.99999997E-7 : f32
    %239 = vector.broadcast %cst_78 : f32 to vector<16x1xf32>
    %240 = arith.addf %238, %239 : vector<16x1xf32>
    %241 = tpu.reciprocal %240 : vector<16x1xf32> -> vector<16x1xf32>
    %242 = vector.broadcast %231 : vector<16x1xf32> to vector<16x32xf32>
    %243 = arith.subf %224, %242 : vector<16x32xf32>
    %244 = vector.broadcast %241 : vector<16x1xf32> to vector<16x32xf32>
    %245 = arith.mulf %243, %244 : vector<16x32xf32>
    %246 = vector.broadcast %5 : vector<1x32xf32> to vector<16x32xf32>
    %247 = arith.mulf %245, %246 : vector<16x32xf32>
    %248 = vector.broadcast %6 : vector<1x32xf32> to vector<16x32xf32>
    %249 = arith.addf %247, %248 : vector<16x32xf32>
    %c0_79 = arith.constant 0 : index
    %c0_80 = arith.constant 0 : index
    %250 = vector.load %arg6[%c0_79, %c0_80] : memref<32x64xf32, #tpu.memory_space<vmem>>, vector<32x64xf32>
    %cst_81 = arith.constant dense<0.000000e+00> : vector<16x64xf32>
    %251 = tpu.matmul %249, %250, %cst_81 {dimension_numbers = #tpu.dot_dimension_numbers<[1], [0], [0], [1], [0, 0, 1, 1], [], []>} : vector<16x32xf32>, vector<32x64xf32>, vector<16x64xf32> -> vector<16x64xf32>
    %c0_82 = arith.constant 0 : index
    %c0_83 = arith.constant 0 : index
    %252 = vector.load %arg7[%c0_82, %c0_83] : memref<1x64xf32, #tpu.memory_space<vmem>>, vector<1x64xf32>
    %253 = vector.broadcast %252 : vector<1x64xf32> to vector<16x64xf32>
    %254 = arith.addf %251, %253 : vector<16x64xf32>
    %cst_84 = arith.constant 0.000000e+00 : f32
    %255 = vector.broadcast %cst_84 : f32 to vector<16x64xf32>
    %256 = arith.maximumf %254, %255 : vector<16x64xf32>
    %c0_85 = arith.constant 0 : index
    %c0_86 = arith.constant 0 : index
    %257 = vector.load %arg8[%c0_85, %c0_86] : memref<64x32xf32, #tpu.memory_space<vmem>>, vector<64x32xf32>
    %cst_87 = arith.constant dense<0.000000e+00> : vector<16x32xf32>
    %258 = tpu.matmul %256, %257, %cst_87 {dimension_numbers = #tpu.dot_dimension_numbers<[1], [0], [0], [1], [0, 0, 1, 1], [], []>} : vector<16x64xf32>, vector<64x32xf32>, vector<16x32xf32> -> vector<16x32xf32>
    %c0_88 = arith.constant 0 : index
    %c0_89 = arith.constant 0 : index
    %259 = vector.load %arg9[%c0_88, %c0_89] : memref<1x32xf32, #tpu.memory_space<vmem>>, vector<1x32xf32>
    %260 = vector.broadcast %259 : vector<1x32xf32> to vector<16x32xf32>
    %261 = arith.addf %258, %260 : vector<16x32xf32>
    %262 = arith.addf %224, %261 : vector<16x32xf32>
    %c0_90 = arith.constant 0 : index
    %c0_91 = arith.constant 0 : index
    %263 = vector.load %arg11[%c0_90, %c0_91] : memref<16x32xf32, #tpu.memory_space<vmem>>, vector<16x32xf32>
    tpu.vector_store %arg11[%c0_90, %c0_91], %262 {strides = array<i32>} : memref<16x32xf32, #tpu.memory_space<vmem>>, vector<16x32xf32>,
    return
  }
}

</mosaic_0001>

<bundles_post_ra>
// kernel: tpu_custom_call.1
= control target key start
LH: loop header
LB: loop body
LE: loop exit
PB: predicated region body
PF: predicated region fallthrough
CT: control target
= control target key end

     0   :  { %16 = vsyncpa [#allocation3], 0  ;;  %s3297_s0 = inlined_call_operand.hbm [shape: f32[16,32], index: 0, kind: input, shape index: {}]   ;;  %s3298_s1 = inlined_call_operand.hbm [shape: f32[2,8], index: 1, kind: input, shape index: {}]   ;;  %s3299_s2 = inlined_call_operand.vmem [shape: f32[32,96], index: 2, kind: input, shape index: {}]   ;;  %s3300_s3 = inlined_call_operand.vmem [shape: f32[1,96], index: 3, kind: input, shape index: {}]   ;;  %s3301_s4 = inlined_call_operand.vmem [shape: f32[32,32], index: 4, kind: input, shape index: {}]   ;;  %s3302_s5 = inlined_call_operand.vmem [shape: f32[1,32], index: 5, kind: input, shape index: {}]   ;;  %s3303_s6 = inlined_call_operand.vmem [shape: f32[32,64], index: 6, kind: input, shape index: {}]   ;;  %s3304_s7 = inlined_call_operand.vmem [shape: f32[1,64], index: 7, kind: input, shape index: {}]   ;;  %s3305_s8 = inlined_call_operand.vmem [shape: f32[64,32], index: 8, kind: input, shape index: {}]   ;;  %s3306_s9 = inlined_call_operand.vmem [shape: f32[1,32], index: 9, kind: input, shape index: {}]   ;;  %s3307_s10 = inlined_call_operand.vmem [shape: f32[4,32], index: 10, kind: input, shape index: {}]   ;;  %s3308_s11 = inlined_call_operand.hbm [shape: f32[16,32], index: 11, kind: output, shape index: {}]  }
   0x1   :  { %17 = vsyncpa [#allocation6], 0 }
   0x2   :  { %18 = vsyncpa [#allocation4], 0  ;;  %s2843_s17 = smov [#allocation2]  }
   0x3   :  { %s24_s18 = sshll.u32 %s2843_s17, 4  ;;  %s25_s18 = int_to_ptr.vmem [resolvable:$true] %s24_s18 }
   0x4   :  { %s2785_s19 = scalar_lea.vmem %s25_s18, 256  ;;  %p2790_p1 = scmp.lt.s32.totalorder %s25_s18, %s25_s18 }
   0x5   :  { %p2786_p0 = scmp.ne.s32.totalorder %s25_s18, %s2785_s19  ;;  %p2791_p2 = scmp.lt.s32.totalorder %s2785_s19, %s2785_s19 }
   0x7   :  { %p2792_p3 = por %p2791_p2, %p2790_p1 }
   0x9   :  { %p2793_p4 = pnand %p2792_p3, %p2786_p0 }
   0xb   :  { %2796 = shalt.err (!%p2793_p4)
}
   0xc   :  { %s2844_s20 = smov 128   ;;  %s2845_s21 = smov 8  }
   0xd   :  { %30 = dma.hbm_to_vmem [thread:$0]  %s3297_s0, 256, %s25_s18, [#allocation3], %s2844_s20, %s2844_s20, %s2845_s21  }
   0xe   :  { %s2846_s24 = smov [#allocation5]  }
   0xf   :  { %s37_s25 = sshll.u32 %s2846_s24, 4  ;;  %s38_s25 = int_to_ptr.vmem [resolvable:$true] %s37_s25 }
  0x10   :  { %s2805_s26 = scalar_lea.vmem %s38_s25, 32  ;;  %p2810_p6 = scmp.lt.s32.totalorder %s38_s25, %s38_s25 }
  0x11   :  { %p2806_p5 = scmp.ne.s32.totalorder %s38_s25, %s2805_s26  ;;  %p2811_p7 = scmp.lt.s32.totalorder %s2805_s26, %s2805_s26 }
  0x13   :  { %p2812_p8 = por %p2811_p7, %p2810_p6 }
  0x15   :  { %p2813_p9 = pnand %p2812_p8, %p2806_p5 }
  0x17   :  { %2816 = shalt.err (!%p2813_p9)
}
  0x18   :  { %40 = dma.hbm_to_vmem [thread:$0]  %s3298_s1, 32, %s38_s25, [#allocation6]  }
  0x19   :  { %2837 = dma.done.wait [#allocation3], 256  }
  0x1a   :  { %2838 = vsyncadd [#allocation3], 4294967040 }
  0x1b   :  { %2839 = dma.done.wait [#allocation6], 32  }
  0x1c   :  { %2840 = vsyncadd [#allocation6], 4294967264  ;;  %vm72_vm0 = vcmask 261120   ;;  %v2930_v0 = vld [vmem:[#allocation2] sm:$0xff]  ;;  %v2932_v1 = vld [vmem:[#allocation2 + $0x8] sm:$0xff]  ;;  %v119_v35 = vlaneseq  ;;  %v2847_v55 = vmov 0.0  }
  0x1d   :  { %v73_v2 = vsel %vm72_vm0, %v2930_v0, 0.0  ;;  %v79_v3 = vmul.f32 %v2930_v0, %v2930_v0  ;;  %v80_v4 = vmul.f32 %v2932_v1, %v2932_v1  ;;  %v76_v6 = vsel %vm72_vm0, %v2932_v1, 0.0  ;;  %v134_v8 = vld [vmem:[%s3299_s2 + $0x18] sm:$0xff]  ;;  %v133_v9 = vld [vmem:[%s3299_s2 + $0x10] sm:$0xff]  ;;  %v132_v10 = vld [vmem:[%s3299_s2 + $0x8] sm:$0xff]  ;;  %2566 = vmatprep.subr.mxu1 %v2847_v55  ;;  %s2849_s18 = smov 88  }
  0x1e   :  { %74 = vadd.xlane.f32.xlu0 %v73_v2  ;;  %2550 = vmatprep.subr.mxu0 %v134_v8  ;;  %v131_v11 = vld [vmem:[%s3299_s2] sm:$0xff]  ;;  %v2956_v39 = vshrl.u32 %v119_v35, 7  ;;  %vm2848_vm5 = vmmov 0   ;;  %s2850_s19 = smov 96   ;;  %s2851_s22 = smov 120   ;;  %vm234_vm6 = vcmask 64512  }
  0x1f   :  { %v81_v5 = vsel %vm72_vm0, %v79_v3, 0.0  ;;  %v84_v7 = vsel %vm72_vm0, %v80_v4, 0.0  ;;  %2551 = vmatpush3.msra.mxu0 %v134_v8  ;;  %v2962_v41 = vld [vmem:[%s3307_s10] sm:$0xf]  ;;  %2568 = vmatprep.mubr.msk.f32.mxu1 %vm2848_vm5, %v2847_v55  ;;  %v3004_v3 = vld [vmem:[#allocation5] ss:$0 sm:$0xff] }
  0x20   :  { %82 = vadd.xlane.f32.xlu1 %v81_v5  ;;  %2552 = vmatprep.subr.mxu0 %v133_v9  ;;  %v121_v40 = vsub.s32 0, %v2956_v39  ;;  %v127_v42 = vsub.s32 1, %v2956_v39  ;;  %v2436_v56 = vld [vmem:[%s3300_s3] ss:$0 sm:$0xff]  ;;  %vm230_vm7 = vcmp.ne.f32.partialorder %v3004_v3, 0.0  ;;  %s2852_s3 = smov 64  }
  0x21   :  { %2553 = vmatpush3.msra.mxu0 %v133_v9  ;;  %s2853_s23 = smov 80   ;;  %s2854_s24 = smov 112   ;;  %vm2332_vm13 = vcmask 523264  }
  0x22   :  { %77 = vadd.xlane.f32.xlu0 %v76_v6  ;;  %2554 = vmatprep.subr.mxu0 %v132_v10  ;;  %v122_v44 = vrot.slane %v2962_v41, %v121_v40  ;;  %v128_v47 = vrot.slane %v2962_v41, %v127_v42  ;;  %s2855_s25 = smov 56   ;;  %s2856_s1 = smov 72  }
  0x23   :  { %2555 = vmatpush3.msra.mxu0 %v132_v10  ;;  %s2857_s29 = smov 104   ;;  %s2858_s30 = smov 48  }
  0x24   :  { %85 = vadd.xlane.f32.xlu1 %v84_v7  ;;  %2556 = vmatprep.subr.mxu0 %v131_v11  ;;  %s2859_s14 = smov 40  }
  0x25   :  { %2557 = vmatpush3.msra.mxu0 %v131_v11 }
  0x26   :  { %2561 = vmatprep.subr.mxu0 %v2847_v55 }
  0xa7   :  { %v75_v12 = vpop.xlane.xlu0 %74 }
  0xa8   :  { %v87_v13 = vmul.f32 0.03125, %v75_v12 }
  0xa9   :  { %v83_v14 = vpop.xlane.xlu1 %82 }
  0xaa   :  { %v89_v15 = vmul.f32 %v87_v13, %v75_v12  ;;  %v115_v43 = vsub.f32 %v2930_v0, %v87_v13 }
  0xab   :  { %v78_v16 = vpop.xlane.xlu0 %77 }
  0xac   :  { %v91_v17 = vsub.f32 %v83_v14, %v89_v15  ;;  %v88_v18 = vmul.f32 0.03125, %v78_v16 }
  0xad   :  { %v86_v19 = vpop.xlane.xlu1 %85 }
  0xae   :  { %v93_v20 = vmax.f32 %v91_v17, 0.0  ;;  %v90_v21 = vmul.f32 %v88_v18, %v78_v16  ;;  %v116_v49 = vsub.f32 %v2932_v1, %v88_v18 }
  0xb0   :  { %v95_v22 = vmul.f32 0.032258064, %v93_v20  ;;  %v92_v23 = vsub.f32 %v86_v19, %v90_v21 }
  0xb2   :  { %2729 = vrsqrt.f32 %v95_v22  ;;  %v94_v24 = vmax.f32 %v92_v23, 0.0  ;;  %vm99_vm1 = vcmp.eq.f32.partialorder %v95_v22, inf  ;;  %v102_v28 = vand.u32 2147483648, %v95_v22 }
  0xb3   :  { %vm101_vm2 = vcmp.eq.f32.partialorder %v95_v22, 0.0 }
  0xb4   :  { %v96_v25 = vmul.f32 0.032258064, %v94_v24 }
  0xb6   :  { %2731 = vrsqrt.f32 %v96_v25  ;;  %vm106_vm3 = vcmp.eq.f32.partialorder %v96_v25, inf  ;;  %v109_v34 = vand.u32 2147483648, %v96_v25  ;;  %vm108_vm4 = vcmp.eq.f32.partialorder %v96_v25, 0.0 }
  0xbf   :  { %v2730_v26 = vpop.eup %2729 }
  0xc0   :  { %v98_v27 = vmul.f32 %v2730_v26, %v95_v22 }
  0xc2   :  { %v100_v29 = vsel %vm99_vm1, %v95_v22, %v98_v27 }
  0xc3   :  { %v103_v30 = vsel %vm101_vm2, %v102_v28, %v100_v29  ;;  %v2732_v31 = vpop.eup %2731 }
  0xc4   :  { %v111_v32 = vadd.f32 1e-06, %v103_v30  ;;  %v105_v33 = vmul.f32 %v2732_v31, %v96_v25  ;;  %v3034_v30 = vld [vmem:[%s3301_s4] sm:$0xff]  ;;  %v3040_v31 = vld [vmem:[%s3301_s4 + $0x8] sm:$0xff] }
  0xc6   :  { %2733 = vrcp.f32 %v111_v32  ;;  %v107_v36 = vsel %vm106_vm3, %v96_v25, %v105_v33 }
  0xc7   :  { %v110_v37 = vsel %vm108_vm4, %v109_v34, %v107_v36 }
  0xc8   :  { %v112_v38 = vadd.f32 1e-06, %v110_v37 }
  0xca   :  { %2735 = vrcp.f32 %v112_v38 }
  0xd3   :  { %v2734_v45 = vpop.eup %2733 }
  0xd4   :  { %v117_v46 = vmul.f32 %v2734_v45, %v115_v43 }
  0xd6   :  { %v123_v48 = vmul.f32 %v122_v44, %v117_v46 }
  0xd7   :  { %v2736_v50 = vpop.eup %2735 }
  0xd8   :  { %v129_v51 = vadd.f32 %v128_v47, %v123_v48  ;;  %v118_v52 = vmul.f32 %v2736_v50, %v116_v49 }
  0xda   :  { %2558 = vmatprep.mubr.msk.f32.mxu0 %vm72_vm0, %v129_v51  ;;  %v124_v53 = vmul.f32 %v122_v44, %v118_v52 }
  0xdc   :  { %v130_v54 = vadd.f32 %v128_v47, %v124_v53 }
  0xde   :  { %2559 = vmatmul.mubr.msk.f32.vlgmr.msra.gmra.mxu0 %vm72_vm0, %v130_v54 }
  0xdf   :  { %2563 = vmatprep.mubr.msk.f32.mxu0 %vm2848_vm5, %v2847_v55 }
 0x19e   :  { %v2560_v57 = vpop.f32.mrf.mxu0 }
 0x19f   :  { %v2980_v58 = vadd.f32 %v2560_v57, %v2436_v56 }
 0x1a0   :  { %v214_v59 = vpop.f32.mrf.mxu0 }
 0x1a1   :  { %v2982_v60 = vadd.f32 %v2436_v56, %v214_v59 }
 0x1a3   :  { %400 = vrot.lane.b32.xlu1 %v2982_v60, %s2849_s18  ;;  %232 = vrot.lane.b32.xlu0 %v2982_v60, %s2850_s19  ;;  %v2989_v61 = vmul.f32 0.35355338, %v2982_v60 }
 0x1a7   :  { %398 = vrot.lane.b32.xlu1 %v2989_v61, %s2851_s22 }
 0x215   :  { %v233_v62 = vpop.permute.xlu0 %232  ;;  %v401_v63 = vpop.permute.xlu1 %400 }
 0x216   :  { %2562 = vmatpush3.xpose.msk.msra.mxu0 %vm234_vm6, %v233_v62 }
 0x217   :  { %2571 = vmatprep.subr.mxu0 %v2847_v55 }
 0x219   :  { %2564 = vmatmul.mubr.msk.f32.vlgmr.msra.gmra.mxu0 %vm234_vm6, %v2989_v61  ;;  %v399_v2 = vpop.permute.xlu1 %398 }
 0x21a   :  { %2572 = vmatpush3.xpose.msk.msra.mxu0 %vm234_vm6, %v401_v63  ;;  %2573 = vmatprep.mubr.msk.f32.mxu0 %vm2848_vm5, %v2847_v55  ;;  %v3082_v63 = vld [vmem:[%s3301_s4 + $0x10] sm:$0xff] }
 0x21b   :  { %2581 = vmatprep.subr.mxu0 %v2847_v55 }
 0x21d   :  { %2574 = vmatmul.mubr.msk.f32.vlgmr.msra.gmra.mxu0 %vm234_vm6, %v399_v2 }
 0x21e   :  { %2583 = vmatprep.mubr.msk.f32.mxu0 %vm2848_vm5, %v2847_v55  ;;  %2582 = vmatpush3.msra.mxu0 %v3040_v31 }
 0x21f   :  { %2591 = vmatprep.subr.mxu0 %v2847_v55 }
 0x2d9   :  { %v306_v4 = vpop.f32.mrf.mxu0 }
 0x2da   :  { %v310_v5 = vsel %vm230_vm7, %v306_v4, -1e+09 }
 0x2db   :  { %v2565_v6 = vpop.f32.mrf.mxu0  ;;  %v311_v7 = vsel %vm234_vm6, %v310_v5, -inf }
 0x2dc   :  { %312 = vmax.xlane.f32.xlu1 %v311_v7 }
 0x2dd   :  { %v472_v8 = vpop.f32.mrf.mxu0 }
 0x2de   :  { %v476_v9 = vsel %vm230_vm7, %v472_v8, -1e+09 }
 0x2df   :  { %v2575_v10 = vpop.f32.mrf.mxu0  ;;  %v477_v11 = vsel %vm234_vm6, %v476_v9, -inf }
 0x2e0   :  { %478 = vmax.xlane.f32.xlu0 %v477_v11 }
 0x2ed   :  { %322 = vrot.lane.b32.xlu1 %v2982_v60, %s2852_s3 }
 0x2f1   :  { %712 = vrot.lane.b32.xlu1 %v2982_v60, %s2853_s23 }
 0x2f5   :  { %710 = vrot.lane.b32.xlu1 %v2989_v61, %s2854_s24 }
 0x365   :  { %v313_v12 = vpop.xlane.xlu1 %312 }
 0x366   :  { %v314_v13 = vsub.f32 %v310_v5, %v313_v12 }
 0x368   :  { %v315_v14 = vmul.f32 1.442695, %v314_v13 }
 0x369   :  { %v323_v15 = vpop.permute.xlu1 %322  ;;  %v479_v16 = vpop.xlane.xlu0 %478 }
 0x36a   :  { %2737 = vpow2.f32 %v315_v14  ;;  %v480_v17 = vsub.f32 %v476_v9, %v479_v16  ;;  %2567 = vmatpush3.msra.mxu1 %v323_v15  ;;  %v3099_v14 = vmul.f32 0.35355338, %v2980_v58 }
 0x36b   :  { %2576 = vmatprep.subr.mxu1 %v2847_v55 }
 0x36c   :  { %v481_v18 = vmul.f32 1.442695, %v480_v17 }
 0x36d   :  { %v713_v33 = vpop.permute.xlu1 %712 }
 0x36e   :  { %2739 = vpow2.f32 %v481_v18 }
 0x371   :  { %v711_v37 = vpop.permute.xlu1 %710 }
 0x377   :  { %v2738_v19 = vpop.eup %2737 }
 0x378   :  { %v317_v20 = vsel %vm234_vm6, %v2738_v19, 0.0 }
 0x379   :  { %318 = vadd.xlane.f32.xlu0 %v317_v20 }
 0x37b   :  { %v2740_v21 = vpop.eup %2739 }
 0x37c   :  { %v483_v22 = vsel %vm234_vm6, %v2740_v21, 0.0 }
 0x37d   :  { %484 = vadd.xlane.f32.xlu0 %v483_v22 }
 0x393   :  { %488 = vrot.lane.b32.xlu0 %v2982_v60, %s2855_s25 }
 0x402   :  { %v319_v23 = vpop.xlane.xlu0 %318 }
 0x403   :  { %2741 = vrcp.f32 %v319_v23  ;;  %v3123_v23 = vld [vmem:[%s3301_s4 + $0x18] sm:$0xff] }
 0x406   :  { %v485_v24 = vpop.xlane.xlu0 %484 }
 0x407   :  { %2743 = vrcp.f32 %v485_v24  ;;  %v3127_v24 = vld [vmem:[#allocation5 + $0x1] ss:$0 sm:$0xff] }
 0x408   :  { %vm1195_vm8 = vcmp.ne.f32.partialorder %v3127_v24, 0.0 }
 0x40a   :  { %v489_v27 = vpop.permute.xlu0 %488 }
 0x410   :  { %v2742_v25 = vpop.eup %2741 }
 0x411   :  { %v321_v26 = vmul.f32 %v2742_v25, %v2738_v19 }
 0x413   :  { %2569 = vmatmul.mubr.msk.f32.vlgmr.msra.gmra.mxu1 %vm234_vm6, %v321_v26 }
 0x414   :  { %v2744_v28 = vpop.eup %2743  ;;  %2577 = vmatpush3.msra.mxu1 %v489_v27  ;;  %2578 = vmatprep.mubr.msk.f32.mxu1 %vm2848_vm5, %v2847_v55 }
 0x415   :  { %v487_v29 = vmul.f32 %v2744_v28, %v2740_v21  ;;  %2586 = vmatprep.subr.mxu1 %v2847_v55 }
 0x417   :  { %2579 = vmatmul.mubr.msk.f32.vlgmr.msra.gmra.mxu1 %vm234_vm6, %v487_v29 }
 0x418   :  { %2588 = vmatprep.mubr.msk.f32.mxu1 %vm2848_vm5, %v2847_v55  ;;  %2587 = vmatpush3.msra.mxu1 %v3034_v30 }
 0x419   :  { %2596 = vmatprep.subr.mxu1 %v2847_v55 }
 0x4d3   :  { %v394_v32 = vpop.f32.mrf.mxu1 }
 0x4d4   :  { %2589 = vmatmul.mubr.msk.f32.vlgmr.msra.gmra.mxu1 %vm234_vm6, %v394_v32 }
 0x4d5   :  { %v2570_v34 = vpop.f32.mrf.mxu1  ;;  %2598 = vmatprep.mubr.msk.f32.mxu1 %vm2848_vm5, %v2847_v55 }
 0x4d7   :  { %v560_v35 = vpop.f32.mrf.mxu1 }
 0x4d8   :  { %2584 = vmatmul.mubr.msk.f32.vlgmr.msra.gmra.mxu0 %vm234_vm6, %v560_v35 }
 0x4d9   :  { %2592 = vmatpush3.xpose.msk.msra.mxu0 %vm234_vm6, %v713_v33  ;;  %v2580_v36 = vpop.f32.mrf.mxu1  ;;  %2593 = vmatprep.mubr.msk.f32.mxu0 %vm2848_vm5, %v2847_v55 }
 0x4da   :  { %2601 = vmatprep.subr.mxu0 %v2847_v55 }
 0x4dc   :  { %2594 = vmatmul.mubr.msk.f32.vlgmr.msra.gmra.mxu0 %vm234_vm6, %v711_v37 }
 0x4dd   :  { %2603 = vmatprep.mubr.msk.f32.mxu0 %vm2848_vm5, %v2847_v55  ;;  %2602 = vmatpush3.msra.mxu0 %v3082_v63 }
 0x4de   :  { %2611 = vmatprep.subr.mxu0 %v2847_v55 }
 0x594   :  { %v706_v38 = vpop.f32.mrf.mxu1 }
 0x596   :  { %v2590_v40 = vpop.f32.mrf.mxu1 }
 0x598   :  { %v633_v42 = vpop.f32.mrf.mxu0 }
 0x599   :  { %v3056_v43 = vadd.f32 %v706_v38, %v633_v42 }
 0x59a   :  { %v2585_v44 = vpop.f32.mrf.mxu0 }
 0x59c   :  { %v784_v45 = vpop.f32.mrf.mxu0 }
 0x59d   :  { %v788_v46 = vsel %vm230_vm7, %v784_v45, -1e+09 }
 0x59e   :  { %v2595_v47 = vpop.f32.mrf.mxu0  ;;  %v789_v48 = vsel %vm234_vm6, %v788_v46, -inf }
 0x59f   :  { %790 = vmax.xlane.f32.xlu1 %v789_v48 }
 0x5b0   :  { %952 = vrot.lane.b32.xlu1 %v2982_v60, %s2856_s1 }
 0x5b4   :  { %950 = vrot.lane.b32.xlu1 %v2989_v61, %s2857_s29 }
 0x5b8   :  { %1197 = vrot.lane.b32.xlu1 %v2980_v58, %s2850_s19 }
 0x628   :  { %v791_v49 = vpop.xlane.xlu1 %790 }
 0x629   :  { %v792_v50 = vsub.f32 %v788_v46, %v791_v49 }
 0x62b   :  { %v793_v51 = vmul.f32 1.442695, %v792_v50 }
 0x62c   :  { %v953_v59 = vpop.permute.xlu1 %952 }
 0x62d   :  { %2745 = vpow2.f32 %v793_v51 }
 0x630   :  { %v951_v62 = vpop.permute.xlu1 %950 }
 0x634   :  { %v1198_v17 = vpop.permute.xlu1 %1197 }
 0x63a   :  { %v2746_v52 = vpop.eup %2745 }
 0x63b   :  { %v795_v53 = vsel %vm234_vm6, %v2746_v52, 0.0 }
 0x63c   :  { %796 = vadd.xlane.f32.xlu0 %v795_v53 }
 0x652   :  { %800 = vrot.lane.b32.xlu0 %v2982_v60, %s2858_s30 }
 0x6c5   :  { %v797_v54 = vpop.xlane.xlu0 %796 }
 0x6c6   :  { %2747 = vrcp.f32 %v797_v54 }
 0x6c9   :  { %v801_v56 = vpop.permute.xlu0 %800 }
 0x6ca   :  { %2597 = vmatpush3.msra.mxu1 %v801_v56 }
 0x6cb   :  { %2606 = vmatprep.subr.mxu1 %v2847_v55 }
 0x6d3   :  { %v2748_v57 = vpop.eup %2747 }
 0x6d4   :  { %v799_v61 = vmul.f32 %v2748_v57, %v2746_v52 }
 0x6d6   :  { %2599 = vmatmul.mubr.msk.f32.vlgmr.msra.gmra.mxu1 %vm234_vm6, %v799_v61 }
 0x6d7   :  { %2607 = vmatpush3.xpose.msk.msra.mxu1 %vm234_vm6, %v953_v59  ;;  %2608 = vmatprep.mubr.msk.f32.mxu1 %vm2848_vm5, %v2847_v55 }
 0x6d8   :  { %2616 = vmatprep.subr.mxu1 %v2847_v55 }
 0x6da   :  { %2609 = vmatmul.mubr.msk.f32.vlgmr.msra.gmra.mxu1 %vm234_vm6, %v951_v62 }
 0x6db   :  { %2618 = vmatprep.mubr.msk.f32.mxu1 %vm2848_vm5, %v2847_v55  ;;  %2617 = vmatpush3.msra.mxu1 %v3123_v23 }
 0x6dc   :  { %2626 = vmatprep.subr.mxu1 %v2847_v55 }
 0x796   :  { %v872_v2 = vpop.f32.mrf.mxu1 }
 0x797   :  { %2604 = vmatmul.mubr.msk.f32.vlgmr.msra.gmra.mxu0 %vm234_vm6, %v872_v2 }
 0x798   :  { %v2600_v4 = vpop.f32.mrf.mxu1  ;;  %2613 = vmatprep.mubr.msk.f32.mxu0 %vm2848_vm5, %v2847_v55 }
 0x79a   :  { %v1024_v5 = vpop.f32.mrf.mxu1 }
 0x79b   :  { %v1028_v6 = vsel %vm230_vm7, %v1024_v5, -1e+09 }
 0x79c   :  { %v2610_v7 = vpop.f32.mrf.mxu1  ;;  %v1029_v8 = vsel %vm234_vm6, %v1028_v6, -inf }
 0x79d   :  { %1030 = vmax.xlane.f32.xlu0 %v1029_v8 }
 0x7b3   :  { %1040 = vrot.lane.b32.xlu0 %v2982_v60, %s2859_s14 }
 0x7b7   :  { %1364 = vrot.lane.b32.xlu0 %v2980_v58, %s2849_s18 }
 0x826   :  { %v1031_v9 = vpop.xlane.xlu0 %1030 }
 0x827   :  { %v1032_v10 = vsub.f32 %v1028_v6, %v1031_v9 }
 0x829   :  { %v1033_v11 = vmul.f32 1.442695, %v1032_v10 }
 0x82a   :  { %v1041_v12 = vpop.permute.xlu0 %1040 }
 0x82b   :  { %2749 = vpow2.f32 %v1033_v11  ;;  %2612 = vmatpush3.msra.mxu0 %v1041_v12 }
 0x82c   :  { %2621 = vmatprep.subr.mxu0 %v2847_v55 }
 0x82e   :  { %v1365_v21 = vpop.permute.xlu0 %1364 }
 0x838   :  { %v2750_v3 = vpop.eup %2749 }
 0x839   :  { %v1035_v13 = vsel %vm234_vm6, %v2750_v3, 0.0 }
 0x83a   :  { %1036 = vadd.xlane.f32.xlu1 %v1035_v13 }
 0x84b   :  { %1362 = vrot.lane.b32.xlu1 %v3099_v14, %s2851_s22 }
 0x857   :  { %v945_v60 = vpop.f32.mrf.mxu0 }
 0x858   :  { %v949_v15 = vadd.f32 %v945_v60, %v3056_v43 }
 0x859   :  { %v2605_v16 = vpop.f32.mrf.mxu0 }
 0x8c3   :  { %v1037_v18 = vpop.xlane.xlu1 %1036 }
 0x8c4   :  { %2751 = vrcp.f32 %v1037_v18 }
 0x8c7   :  { %v1363_v22 = vpop.permute.xlu1 %1362 }
 0x8d1   :  { %v2752_v19 = vpop.eup %2751 }
 0x8d2   :  { %v1039_v20 = vmul.f32 %v2752_v19, %v2750_v3 }
 0x8d4   :  { %2614 = vmatmul.mubr.msk.f32.vlgmr.msra.gmra.mxu0 %vm234_vm6, %v1039_v20 }
 0x8d5   :  { %2622 = vmatpush3.xpose.msk.msra.mxu0 %vm234_vm6, %v1198_v17  ;;  %2623 = vmatprep.mubr.msk.f32.mxu0 %vm2848_vm5, %v2847_v55 }
 0x8d6   :  { %2631 = vmatprep.subr.mxu0 %v2847_v55 }
 0x8d8   :  { %2624 = vmatmul.mubr.msk.f32.vlgmr.msra.gmra.mxu0 %vm234_vm6, %v3099_v14 }
 0x8d9   :  { %2632 = vmatpush3.xpose.msk.msra.mxu0 %vm234_vm6, %v1365_v21  ;;  %2633 = vmatprep.mubr.msk.f32.mxu0 %vm2848_vm5, %v2847_v55 }
 0x8da   :  { %2641 = vmatprep.subr.mxu0 %v2847_v55 }
 0x8dc   :  { %2634 = vmatmul.mubr.msk.f32.vlgmr.msra.gmra.mxu0 %vm234_vm6, %v1363_v22 }
 0x8dd   :  { %2642 = vmatpush3.msra.mxu0 %v3040_v31  ;;  %2643 = vmatprep.mubr.msk.f32.mxu0 %vm2848_vm5, %v2847_v55 }
 0x8de   :  { %2651 = vmatprep.subr.mxu0 %v2847_v55 }
 0x994   :  { %v1112_v25 = vpop.f32.mrf.mxu0 }
 0x995   :  { %2619 = vmatmul.mubr.msk.f32.vlgmr.msra.gmra.mxu1 %vm234_vm6, %v1112_v25 }
 0x996   :  { %v2615_v26 = vpop.f32.mrf.mxu0  ;;  %2628 = vmatprep.mubr.msk.f32.mxu1 %vm2848_vm5, %v2847_v55 }
 0x998   :  { %v1270_v27 = vpop.f32.mrf.mxu0 }
 0x999   :  { %v1274_v28 = vsel %vm1195_vm8, %v1270_v27, -1e+09 }
 0x99a   :  { %v2625_v29 = vpop.f32.mrf.mxu0  ;;  %v1275_v31 = vsel %vm234_vm6, %v1274_v28, -inf }
 0x99b   :  { %1276 = vmax.xlane.f32.xlu0 %v1275_v31  ;;  %v3202_v29 = vld [vmem:[%s3302_s5] ss:$0 sm:$0xff] }
 0x99c   :  { %v1436_v32 = vpop.f32.mrf.mxu0 }
 0x99d   :  { %v1440_v33 = vsel %vm1195_vm8, %v1436_v32, -1e+09 }
 0x99e   :  { %v2635_v34 = vpop.f32.mrf.mxu0  ;;  %v1441_v35 = vsel %vm234_vm6, %v1440_v33, -inf }
 0x99f   :  { %1442 = vmax.xlane.f32.xlu1 %v1441_v35 }
 0x9b0   :  { %1452 = vrot.lane.b32.xlu1 %v2980_v58, %s2855_s25 }
 0x9b4   :  { %1676 = vrot.lane.b32.xlu1 %v2980_v58, %s2853_s23 }
 0x9b8   :  { %1674 = vrot.lane.b32.xlu1 %v3099_v14, %s2854_s24 }
 0xa24   :  { %v1277_v36 = vpop.xlane.xlu0 %1276 }
 0xa25   :  { %v1278_v37 = vsub.f32 %v1274_v28, %v1277_v36 }
 0xa27   :  { %v1279_v38 = vmul.f32 1.442695, %v1278_v37 }
 0xa28   :  { %v1443_v40 = vpop.xlane.xlu1 %1442 }
 0xa29   :  { %2753 = vpow2.f32 %v1279_v38  ;;  %v1444_v42 = vsub.f32 %v1440_v33, %v1443_v40 }
 0xa2b   :  { %v1445_v43 = vmul.f32 1.442695, %v1444_v42 }
 0xa2c   :  { %v1453_v57 = vpop.permute.xlu1 %1452 }
 0xa2d   :  { %2755 = vpow2.f32 %v1445_v43 }
 0xa30   :  { %v1677_v2 = vpop.permute.xlu1 %1676 }
 0xa36   :  { %v2754_v44 = vpop.eup %2753 }
 0xa37   :  { %v1281_v45 = vsel %vm234_vm6, %v2754_v44, 0.0 }
 0xa38   :  { %1282 = vadd.xlane.f32.xlu0 %v1281_v45 }
 0xa3a   :  { %v2756_v46 = vpop.eup %2755 }
 0xa3b   :  { %v1447_v47 = vsel %vm234_vm6, %v2756_v46, 0.0 }
 0xa3c   :  { %1448 = vadd.xlane.f32.xlu0 %v1447_v47 }
 0xa52   :  { %1286 = vrot.lane.b32.xlu0 %v2980_v58, %s2852_s3 }
 0xa55   :  { %v1185_v48 = vpop.f32.mrf.mxu1 }
 0xa56   :  { %v3149_v49 = vadd.f32 %v1185_v48, %v949_v15 }
 0xa57   :  { %v2620_v50 = vpop.f32.mrf.mxu1 }
 0xa58   :  { %v2154_v27 = vadd.f32 %v3149_v49, %v2930_v0 }
 0xa5a   :  { %v3207_v32 = vadd.f32 %v3202_v29, %v2154_v27 }
 0xa5c   :  { %v2165_v0 = vsel %vm72_vm0, %v3207_v32, 0.0 }
 0xac1   :  { %v1283_v51 = vpop.xlane.xlu0 %1282 }
 0xac2   :  { %2757 = vrcp.f32 %v1283_v51 }
 0xac5   :  { %v1449_v52 = vpop.xlane.xlu0 %1448 }
 0xac6   :  { %2759 = vrcp.f32 %v1449_v52 }
 0xac9   :  { %v1287_v53 = vpop.permute.xlu0 %1286 }
 0xaca   :  { %2627 = vmatpush3.msra.mxu1 %v1287_v53 }
 0xacb   :  { %2636 = vmatprep.subr.mxu1 %v2847_v55 }
 0xacf   :  { %v2758_v54 = vpop.eup %2757 }
 0xad0   :  { %v1285_v56 = vmul.f32 %v2758_v54, %v2754_v44 }
 0xad2   :  { %2629 = vmatmul.mubr.msk.f32.vlgmr.msra.gmra.mxu1 %vm234_vm6, %v1285_v56 }
 0xad3   :  { %v2760_v59 = vpop.eup %2759  ;;  %2637 = vmatpush3.msra.mxu1 %v1453_v57  ;;  %2638 = vmatprep.mubr.msk.f32.mxu1 %vm2848_vm5, %v2847_v55 }
 0xad4   :  { %v1451_v61 = vmul.f32 %v2760_v59, %v2756_v46  ;;  %2646 = vmatprep.subr.mxu1 %v2847_v55 }
 0xad6   :  { %2639 = vmatmul.mubr.msk.f32.vlgmr.msra.gmra.mxu1 %vm234_vm6, %v1451_v61 }
 0xad7   :  { %2647 = vmatpush3.msra.mxu1 %v3034_v30  ;;  %2648 = vmatprep.mubr.msk.f32.mxu1 %vm2848_vm5, %v2847_v55  ;;  %v1675_v30 = vpop.permute.xlu1 %1674 }
 0xad8   :  { %2656 = vmatprep.subr.mxu1 %v2847_v55 }
 0xb92   :  { %v1358_v62 = vpop.f32.mrf.mxu1 }
 0xb93   :  { %2649 = vmatmul.mubr.msk.f32.vlgmr.msra.gmra.mxu1 %vm234_vm6, %v1358_v62  ;;  %v2213_v62 = vsub.s32 2, %v2956_v39 }
 0xb94   :  { %v2630_v4 = vpop.f32.mrf.mxu1  ;;  %2658 = vmatprep.mubr.msk.f32.mxu1 %vm2848_vm5, %v2847_v55 }
 0xb96   :  { %v1524_v5 = vpop.f32.mrf.mxu1 }
 0xb97   :  { %2644 = vmatmul.mubr.msk.f32.vlgmr.msra.gmra.mxu0 %vm234_vm6, %v1524_v5 }
 0xb98   :  { %2652 = vmatpush3.xpose.msk.msra.mxu0 %vm234_vm6, %v1677_v2  ;;  %v2640_v6 = vpop.f32.mrf.mxu1  ;;  %2653 = vmatprep.mubr.msk.f32.mxu0 %vm2848_vm5, %v2847_v55 }
 0xb99   :  { %2661 = vmatprep.subr.mxu0 %v2847_v55  ;;  %v3221_v6 = vrot.slane %v2962_v41, %v2213_v62 }
 0xb9b   :  { %2654 = vmatmul.mubr.msk.f32.vlgmr.msra.gmra.mxu0 %vm234_vm6, %v1675_v30  ;;  %v2219_v30 = vsub.s32 3, %v2956_v39 }
 0xb9c   :  { %2662 = vmatpush3.msra.mxu0 %v3082_v63  ;;  %2663 = vmatprep.mubr.msk.f32.mxu0 %vm2848_vm5, %v2847_v55 }
 0xb9d   :  { %2671 = vmatprep.subr.mxu0 %v2847_v55 }
 0xc53   :  { %v1670_v7 = vpop.f32.mrf.mxu1 }
 0xc55   :  { %v2650_v8 = vpop.f32.mrf.mxu1 }
 0xc56   :  { %v3226_v8 = vrot.slane %v2962_v41, %v2219_v30 }
 0xc57   :  { %v1597_v9 = vpop.f32.mrf.mxu0 }
 0xc58   :  { %v1671_v10 = vadd.f32 %v1670_v7, %v1597_v9 }
 0xc59   :  { %v2645_v11 = vpop.f32.mrf.mxu0 }
 0xc5b   :  { %v1748_v12 = vpop.f32.mrf.mxu0 }
 0xc5c   :  { %v1752_v3 = vsel %vm1195_vm8, %v1748_v12, -1e+09 }
 0xc5d   :  { %v2655_v13 = vpop.f32.mrf.mxu0  ;;  %v1753_v60 = vsel %vm234_vm6, %v1752_v3, -inf }
 0xc5e   :  { %1754 = vmax.xlane.f32.xlu0 %v1753_v60 }
 0xc74   :  { %1764 = vrot.lane.b32.xlu0 %v2980_v58, %s2858_s30 }
 0xc78   :  { %1914 = vrot.lane.b32.xlu0 %v3099_v14, %s2857_s29 }
 0xce7   :  { %v1755_v63 = vpop.xlane.xlu0 %1754 }
 0xce8   :  { %v1756_v15 = vsub.f32 %v1752_v3, %v1755_v63 }
 0xcea   :  { %v1757_v16 = vmul.f32 1.442695, %v1756_v15 }
 0xceb   :  { %v1765_v17 = vpop.permute.xlu0 %1764 }
 0xcec   :  { %2761 = vpow2.f32 %v1757_v16  ;;  %2657 = vmatpush3.msra.mxu1 %v1765_v17 }
 0xced   :  { %2666 = vmatprep.subr.mxu1 %v2847_v55 }
 0xcef   :  { %v1915_v25 = vpop.permute.xlu0 %1914 }
 0xcf9   :  { %v2762_v18 = vpop.eup %2761 }
 0xcfa   :  { %v1759_v19 = vsel %vm234_vm6, %v2762_v18, 0.0 }
 0xcfb   :  { %1760 = vadd.xlane.f32.xlu1 %v1759_v19  ;;  %v2224_v19 = vld [vmem:[%s3303_s6 + $0x8] sm:$0xff] }
 0xd0c   :  { %1916 = vrot.lane.b32.xlu1 %v2980_v58, %s2856_s1 }
 0xd84   :  { %v1761_v20 = vpop.xlane.xlu1 %1760 }
 0xd85   :  { %2763 = vrcp.f32 %v1761_v20  ;;  %v2223_v20 = vld [vmem:[%s3303_s6] sm:$0xff] }
 0xd88   :  { %v1917_v14 = vpop.permute.xlu1 %1916 }
 0xd92   :  { %v2764_v21 = vpop.eup %2763 }
 0xd93   :  { %v1763_v22 = vmul.f32 %v2764_v21, %v2762_v18  ;;  %v2226_v18 = vld [vmem:[%s3303_s6 + $0x18] sm:$0xff] }
 0xd94   :  { %v2324_v21 = vld [vmem:[%s3305_s8 + $0x38] sm:$0xff] }
 0xd95   :  { %2659 = vmatmul.mubr.msk.f32.vlgmr.msra.gmra.mxu1 %vm234_vm6, %v1763_v22  ;;  %v2323_v22 = vld [vmem:[%s3305_s8 + $0x30] sm:$0xff] }
 0xd96   :  { %2667 = vmatpush3.xpose.msk.msra.mxu1 %vm234_vm6, %v1917_v14  ;;  %2668 = vmatprep.mubr.msk.f32.mxu1 %vm2848_vm5, %v2847_v55  ;;  %v2322_v14 = vld [vmem:[%s3305_s8 + $0x28] sm:$0xff] }
 0xd97   :  { %2676 = vmatprep.subr.mxu1 %v2847_v55 }
 0xd99   :  { %2669 = vmatmul.mubr.msk.f32.vlgmr.msra.gmra.mxu1 %vm234_vm6, %v1915_v25  ;;  %v2321_v25 = vld [vmem:[%s3305_s8 + $0x20] sm:$0xff] }
 0xd9a   :  { %2677 = vmatpush3.msra.mxu1 %v3123_v23  ;;  %2678 = vmatprep.mubr.msk.f32.mxu1 %vm2848_vm5, %v2847_v55 }
 0xd9b   :  { %2692 = vmatprep.subr.mxu1 %v2324_v21 }
 0xe55   :  { %v1836_v26 = vpop.f32.mrf.mxu1 }
 0xe56   :  { %2664 = vmatmul.mubr.msk.f32.vlgmr.msra.gmra.mxu0 %vm234_vm6, %v1836_v26 }
 0xe57   :  { %v2660_v28 = vpop.f32.mrf.mxu1  ;;  %2673 = vmatprep.mubr.msk.f32.mxu0 %vm2848_vm5, %v2847_v55  ;;  %v2171_v55 = vmul.f32 %v3207_v32, %v3207_v32 }
 0xe59   :  { %v1988_v31 = vpop.f32.mrf.mxu1  ;;  %v2173_v35 = vsel %vm72_vm0, %v2171_v55, 0.0 }
 0xe5a   :  { %v1992_v23 = vsel %vm1195_vm8, %v1988_v31, -1e+09 }
 0xe5b   :  { %v2670_v33 = vpop.f32.mrf.mxu1  ;;  %v1993_v34 = vsel %vm234_vm6, %v1992_v23, -inf }
 0xe5c   :  { %1994 = vmax.xlane.f32.xlu1 %v1993_v34 }
 0xe60   :  { %2166 = vadd.xlane.f32.xlu1 %v2165_v0 }
 0xe64   :  { %2174 = vadd.xlane.f32.xlu1 %v2173_v35 }
 0xee5   :  { %v1995_v36 = vpop.xlane.xlu1 %1994 }
 0xee6   :  { %v1996_v24 = vsub.f32 %v1992_v23, %v1995_v36 }
 0xee8   :  { %v1997_v37 = vmul.f32 1.442695, %v1996_v24 }
 0xee9   :  { %v2167_v45 = vpop.xlane.xlu1 %2166 }
 0xeea   :  { %2765 = vpow2.f32 %v1997_v37  ;;  %v2179_v46 = vmul.f32 0.03125, %v2167_v45 }
 0xeec   :  { %v2181_v47 = vmul.f32 %v2179_v46, %v2167_v45  ;;  %v2207_v4 = vsub.f32 %v3207_v32, %v2179_v46  ;;  %v2319_v45 = vld [vmem:[%s3305_s8 + $0x10] sm:$0xff]  ;;  %v2318_v46 = vld [vmem:[%s3305_s8 + $0x8] sm:$0xff] }
 0xeed   :  { %v2175_v48 = vpop.xlane.xlu1 %2174 }
 0xeee   :  { %v2183_v49 = vsub.f32 %v2175_v48, %v2181_v47  ;;  %v2317_v47 = vld [vmem:[%s3305_s8] sm:$0xff] }
 0xeef   :  { %v2474_v48 = vld [vmem:[%s3304_s7] ss:$0 sm:$0xff] }
 0xef0   :  { %v2185_v50 = vmax.f32 %v2183_v49, 0.0 }
 0xef2   :  { %v2187_v51 = vmul.f32 0.032258064, %v2185_v50 }
 0xef4   :  { %2767 = vrsqrt.f32 %v2187_v51  ;;  %vm2191_vm9 = vcmp.eq.f32.partialorder %v2187_v51, inf  ;;  %v2194_v56 = vand.u32 2147483648, %v2187_v51  ;;  %vm2193_vm10 = vcmp.eq.f32.partialorder %v2187_v51, 0.0 }
 0xef7   :  { %v2766_v38 = vpop.eup %2765 }
 0xef8   :  { %v1999_v40 = vsel %vm234_vm6, %v2766_v38, 0.0 }
 0xef9   :  { %2000 = vadd.xlane.f32.xlu0 %v1999_v40 }
 0xf01   :  { %v2768_v52 = vpop.eup %2767 }
 0xf02   :  { %v2190_v53 = vmul.f32 %v2768_v52, %v2187_v51 }
 0xf04   :  { %v2192_v54 = vsel %vm2191_vm9, %v2187_v51, %v2190_v53 }
 0xf05   :  { %v2195_v57 = vsel %vm2193_vm10, %v2194_v56, %v2192_v54  ;;  %v2477_v56 = vld [vmem:[%s3306_s9] ss:$0 sm:$0xff] }
 0xf06   :  { %v2203_v59 = vadd.f32 1e-06, %v2195_v57 }
 0xf08   :  { %2769 = vrcp.f32 %v2203_v59 }
 0xf0f   :  { %2004 = vrot.lane.b32.xlu0 %v2980_v58, %s2859_s14 }
 0xf15   :  { %v2770_v2 = vpop.eup %2769 }
 0xf16   :  { %v1909_v42 = vpop.f32.mrf.mxu0  ;;  %v2209_v5 = vmul.f32 %v2770_v2, %v2207_v4 }
 0xf17   :  { %v1913_v43 = vadd.f32 %v1909_v42, %v1671_v10 }
 0xf18   :  { %v2665_v44 = vpop.f32.mrf.mxu0  ;;  %v2215_v7 = vmul.f32 %v3221_v6, %v2209_v5 }
 0xf19   :  { %v2320_v44 = vld [vmem:[%s3305_s8 + $0x18] sm:$0xff]  ;;  %s2860_s8 = smov [#allocation7]  }
 0xf1a   :  { %v2221_v11 = vadd.f32 %v3226_v8, %v2215_v7  ;;  %s2423_s18 = sshll.u32 %s2860_s8, 4  ;;  %s2424_s18 = int_to_ptr.vmem [resolvable:$true] %s2423_s18 }
 0xf1b   :  { %s2817_s7 = scalar_lea.vmem %s2424_s18, 256  ;;  %p2822_p11 = scmp.lt.s32.totalorder %s2424_s18, %s2424_s18 }
 0xf1c   :  { %p2818_p10 = scmp.ne.s32.totalorder %s2424_s18, %s2817_s7  ;;  %p2823_p12 = scmp.lt.s32.totalorder %s2817_s7, %s2817_s7 }
 0xf1e   :  { %p2824_p13 = por %p2823_p12, %p2822_p11 }
 0xf20   :  { %p2825_p0 = pnand %p2824_p13, %p2818_p10 }
 0xf82   :  { %v2001_v58 = vpop.xlane.xlu0 %2000 }
 0xf83   :  { %2771 = vrcp.f32 %v2001_v58 }
 0xf86   :  { %v2005_v61 = vpop.permute.xlu0 %2004 }
 0xf87   :  { %2672 = vmatpush3.msra.mxu0 %v2005_v61 }
 0xf88   :  { %2681 = vmatprep.subr.mxu0 %v2226_v18 }
 0xf90   :  { %v2772_v9 = vpop.eup %2771 }
 0xf91   :  { %v2003_v10 = vmul.f32 %v2772_v9, %v2766_v38 }
 0xf93   :  { %2674 = vmatmul.mubr.msk.f32.vlgmr.msra.gmra.mxu0 %vm234_vm6, %v2003_v10 }
 0xf94   :  { %2689 = vmatprep.mubr.msk.f32.mxu0 %vm72_vm0, %v2221_v11  ;;  %2682 = vmatpush3.msra.mxu0 %v2226_v18 }
0x1053   :  { %v2076_v12 = vpop.f32.mrf.mxu0 }
0x1054   :  { %2679 = vmatmul.mubr.msk.f32.vlgmr.msra.gmra.mxu1 %vm234_vm6, %v2076_v12 }
0x1055   :  { %v2675_v3 = vpop.f32.mrf.mxu0  ;;  %2693 = vmatpush3.msra.mxu1 %v2324_v21 }
0x1056   :  { %2694 = vmatprep.subr.mxu1 %v2323_v22 }
0x1057   :  { %2695 = vmatpush3.msra.mxu1 %v2323_v22 }
0x1058   :  { %2696 = vmatprep.subr.mxu1 %v2322_v14 }
0x1059   :  { %2697 = vmatpush3.msra.mxu1 %v2322_v14 }
0x105a   :  { %2698 = vmatprep.subr.mxu1 %v2321_v25 }
0x105b   :  { %2699 = vmatpush3.msra.mxu1 %v2321_v25 }
0x105c   :  { %2700 = vmatprep.subr.mxu1 %v2320_v44 }
0x105d   :  { %2701 = vmatpush3.msra.mxu1 %v2320_v44 }
0x105e   :  { %2702 = vmatprep.subr.mxu1 %v2319_v45 }
0x105f   :  { %2703 = vmatpush3.msra.mxu1 %v2319_v45 }
0x1060   :  { %2704 = vmatprep.subr.mxu1 %v2318_v46 }
0x1061   :  { %2705 = vmatpush3.msra.mxu1 %v2318_v46 }
0x1062   :  { %2706 = vmatprep.subr.mxu1 %v2317_v47 }
0x1063   :  { %2707 = vmatpush3.msra.mxu1 %v2317_v47 }
0x1114   :  { %v2149_v13 = vpop.f32.mrf.mxu1 }
0x1115   :  { %v2153_v60 = vadd.f32 %v2149_v13, %v1913_v43 }
0x1116   :  { %v2680_v39 = vpop.f32.mrf.mxu1 }
0x1117   :  { %v2155_v63 = vadd.f32 %v2153_v60, %v2932_v1  ;;  %v2225_v1 = vld [vmem:[%s3303_s6 + $0x10] sm:$0xff] }
0x1118   :  { %2683 = vmatprep.subr.mxu0 %v2225_v1 }
0x1119   :  { %v3234_v41 = vadd.f32 %v3202_v29, %v2155_v63  ;;  %2684 = vmatpush3.msra.mxu0 %v2225_v1 }
0x111a   :  { %2685 = vmatprep.subr.mxu0 %v2224_v19 }
0x111b   :  { %v2168_v15 = vsel %vm72_vm0, %v3234_v41, 0.0  ;;  %v2172_v16 = vmul.f32 %v3234_v41, %v3234_v41  ;;  %2686 = vmatpush3.msra.mxu0 %v2224_v19 }
0x111c   :  { %2169 = vadd.xlane.f32.xlu1 %v2168_v15  ;;  %2687 = vmatprep.subr.mxu0 %v2223_v20 }
0x111d   :  { %v2176_v17 = vsel %vm72_vm0, %v2172_v16, 0.0  ;;  %2688 = vmatpush3.msra.mxu0 %v2223_v20 }
0x1120   :  { %2177 = vadd.xlane.f32.xlu1 %v2176_v17 }
0x11a5   :  { %v2170_v26 = vpop.xlane.xlu1 %2169 }
0x11a6   :  { %v2180_v27 = vmul.f32 0.03125, %v2170_v26 }
0x11a8   :  { %v2182_v28 = vmul.f32 %v2180_v27, %v2170_v26  ;;  %v2208_v37 = vsub.f32 %v3234_v41, %v2180_v27 }
0x11a9   :  { %v2178_v29 = vpop.xlane.xlu1 %2177 }
0x11aa   :  { %v2184_v31 = vsub.f32 %v2178_v29, %v2182_v28 }
0x11ac   :  { %v2186_v23 = vmax.f32 %v2184_v31, 0.0 }
0x11ae   :  { %v2188_v33 = vmul.f32 0.032258064, %v2186_v23 }
0x11b0   :  { %2773 = vrsqrt.f32 %v2188_v33  ;;  %vm2198_vm11 = vcmp.eq.f32.partialorder %v2188_v33, inf  ;;  %v2201_v55 = vand.u32 2147483648, %v2188_v33  ;;  %vm2200_vm12 = vcmp.eq.f32.partialorder %v2188_v33, 0.0 }
0x11bd   :  { %v2774_v34 = vpop.eup %2773 }
0x11be   :  { %v2197_v0 = vmul.f32 %v2774_v34, %v2188_v33 }
0x11c0   :  { %v2199_v35 = vsel %vm2198_vm11, %v2188_v33, %v2197_v0 }
0x11c1   :  { %v2202_v36 = vsel %vm2200_vm12, %v2201_v55, %v2199_v35 }
0x11c2   :  { %v2204_v24 = vadd.f32 1e-06, %v2202_v36 }
0x11c4   :  { %2775 = vrcp.f32 %v2204_v24 }
0x11d1   :  { %v2776_v38 = vpop.eup %2775 }
0x11d2   :  { %v2210_v40 = vmul.f32 %v2776_v38, %v2208_v37 }
0x11d4   :  { %v2216_v42 = vmul.f32 %v3221_v6, %v2210_v40 }
0x11d6   :  { %v2222_v43 = vadd.f32 %v3226_v8, %v2216_v42 }
0x11d8   :  { %2690 = vmatmul.mubr.msk.f32.vlgmr.msra.gmra.mxu0 %vm72_vm0, %v2222_v43 }
0x1298   :  { %v2691_v49 = vpop.f32.mrf.mxu0 }
0x1299   :  { %v2312_v50 = vadd.f32 %v2691_v49, %v2474_v48 }
0x129a   :  { %v2306_v51 = vpop.f32.mrf.mxu0 }
0x129b   :  { %v2307_v52 = vadd.f32 %v2474_v48, %v2306_v51  ;;  %v2316_v54 = vmax.f32 %v2312_v50, 0.0 }
0x129d   :  { %v2315_v53 = vmax.f32 %v2307_v52, 0.0 }
0x129f   :  { %2708 = vmatprep.mubr.msk.f32.mxu1 %vm2332_vm13, %v2315_v53 }
0x12a0   :  { %2709 = vmatmul.mubr.msk.f32.vlgmr.msra.gmra.mxu1 %vm2332_vm13, %v2316_v54 }
0x1360   :  { %v2710_v57 = vpop.f32.mrf.mxu1 }
0x1361   :  { %v2411_v59 = vadd.f32 %v2710_v57, %v2477_v56 }
0x1362   :  { %v2405_v58 = vpop.f32.mrf.mxu1 }
0x1363   :  { %v2415_v61 = vadd.f32 %v2411_v59, %v3234_v41  ;;  %v2406_v62 = vadd.f32 %v2477_v56, %v2405_v58 }
0x1365   :  { %2417 = vst.msk [vmem:[#allocation7 + $0x8] sm:$0xff] %vm72_vm0, %v2415_v61  ;;  %v2414_v2 = vadd.f32 %v2406_v62, %v3207_v32 }
0x1367   :  { %2416 = vst.msk [vmem:[#allocation7] sm:$0xff] %vm72_vm0, %v2414_v2 }
0x1368   :  { %2828 = shalt.err (!%p2825_p0)
}
0x1369   :  { %2429 = dma.vmem_to_hbm [thread:$0]  %s2424_s18, 256, %s3308_s11, [#allocation4], %s2844_s20, %s2844_s20, %s2845_s21  }
0x136a   :  { %2841 = dma.done.wait [#allocation4], 256  }
0x136b   :  { %2842 = vsyncadd [#allocation4], 4294967040 }
0x136c   :  { %2433 = vsyncpa [#allocation3], 1 }
0x136d   :  { %2434 = vsyncpa [#allocation6], 1 }
0x136e   :  { %2435 = vsyncpa [#allocation4], 1 }

</bundles_post_ra>
